<compile_context>
chip_gen: v5e
topology: v5e:2x2
jax: 0.10.0
libtpu: 0.0.40
codegen_flags: <defaults>
</compile_context>

<pallas_src>
import functools

import jax
import jax.numpy as jnp
from jax.experimental import pallas as pl
from jax.experimental.pallas import tpu as pltpu

IN_FEATURES = 20002
HIDDEN = 100
OUT = 4

K_PAD = 20480   # 20002 rounded up to a multiple of 128 (and of TK)
H_PAD = 128     # hidden padded to one full lane group
TK = 4096       # K tile -> 5 grid steps (low per-step overhead, big DMA tiles)


def fc_kernel(x_ref, w1_ref, b1_ref, w2_ref, b2_ref, o_ref, acc_ref):
    k = pl.program_id(0)

    @pl.when(k == 0)
    def _init():
        acc_ref[...] = jnp.zeros_like(acc_ref)

    # Linear(20002 -> 100): accumulate bf16 x-tile @ bf16 w1-tile in f32.
    acc_ref[...] += jnp.dot(
        x_ref[...], w1_ref[...], preferred_element_type=jnp.float32
    )

    @pl.when(k == pl.num_programs(0) - 1)
    def _finalize():
        h = acc_ref[...] + b1_ref[...]                      # (B_pad, 128), f32
        # Linear(100 -> 4) (padded hidden rows of w2 are zero, contribute nothing)
        logits = jnp.dot(
            h, w2_ref[...], preferred_element_type=jnp.float32
        ) + b2_ref[...]                                     # (B_pad, 4)
        # Softmax over dim=1 (numerically stable)
        m = jnp.max(logits, axis=1, keepdims=True)
        e = jnp.exp(logits - m)
        o_ref[...] = e / jnp.sum(e, axis=1, keepdims=True)


def prepare_params(w1, b1, w2, b2):
    """Pad params to TPU-friendly shapes; stream the big weight as bf16."""
    w1_p = jnp.zeros((K_PAD, H_PAD), jnp.bfloat16)
    w1_p = w1_p.at[:IN_FEATURES, :HIDDEN].set(w1.astype(jnp.bfloat16))
    b1_p = jnp.zeros((1, H_PAD), jnp.float32).at[:, :HIDDEN].set(b1)
    w2_p = jnp.zeros((H_PAD, OUT), jnp.float32).at[:HIDDEN, :].set(w2)
    b2_p = b2.astype(jnp.float32).reshape(1, OUT)
    return w1_p, b1_p, w2_p, b2_p


@jax.jit
def fc_forward(x, w1_p, b1_p, w2_p, b2_p):
    """x: (B, 20002) f32 (already-flattened view). Returns (B, 4) softmax probs."""
    B = x.shape[0]
    B_pad = max(8, ((B + 7) // 8) * 8)

    # Zero-pad batch and feature dims; cast activations to bf16 for the MXU.
    x_p = jnp.zeros((B_pad, K_PAD), jnp.bfloat16)
    x_p = x_p.at[:B, :IN_FEATURES].set(x.astype(jnp.bfloat16))

    grid = (K_PAD // TK,)

    out = pl.pallas_call(
        fc_kernel,
        out_shape=jax.ShapeDtypeStruct((B_pad, OUT), jnp.float32),
        grid_spec=pltpu.PrefetchScalarGridSpec(
            num_scalar_prefetch=0,
            grid=grid,
            in_specs=[
                pl.BlockSpec((B_pad, TK), lambda k: (0, k)),   # x tile
                pl.BlockSpec((TK, H_PAD), lambda k: (k, 0)),   # w1 tile (streamed)
                pl.BlockSpec((1, H_PAD), lambda k: (0, 0)),    # b1
                pl.BlockSpec((H_PAD, OUT), lambda k: (0, 0)),  # w2
                pl.BlockSpec((1, OUT), lambda k: (0, 0)),      # b2
            ],
            out_specs=pl.BlockSpec((B_pad, OUT), lambda k: (0, 0)),
            scratch_shapes=[pltpu.VMEM((B_pad, H_PAD), jnp.float32)],
        ),
        compiler_params=pltpu.CompilerParams(
            dimension_semantics=("arbitrary",),   # K is a reduction axis
            vmem_limit_bytes=16 << 20,
        ),
    )(x_p, w1_p, b1_p, w2_p, b2_p)

    return out[:B]


def init_params(key):
    """Deterministic init mimicking nn.Linear's U(-1/sqrt(fan_in), 1/sqrt(fan_in))."""
    k1, k2, k3, k4 = jax.random.split(key, 4)
    bound1 = 1.0 / jnp.sqrt(jnp.float32(IN_FEATURES))
    bound2 = 1.0 / jnp.sqrt(jnp.float32(HIDDEN))
    # stored transposed relative to PyTorch: (in, out) so kernel does x @ W
    w1 = jax.random.uniform(k1, (IN_FEATURES, HIDDEN), jnp.float32, -bound1, bound1)
    b1 = jax.random.uniform(k2, (1, HIDDEN), jnp.float32, -bound1, bound1)
    w2 = jax.random.uniform(k3, (HIDDEN, OUT), jnp.float32, -bound2, bound2)
    b2 = jax.random.uniform(k4, (1, OUT), jnp.float32, -bound2, bound2)
    return w1, b1, w2, b2


def reference_forward(x, w1, b1, w2, b2):
    h = x @ w1 + b1
    logits = h @ w2 + b2
    return jax.nn.softmax(logits, axis=1)


if __name__ == "__main__":
    key = jax.random.PRNGKey(0)
    pkey, xkey = jax.random.split(key)

    B = 2  # small batch; feature dim fixed at 20002 by the module definition
    x = jax.random.normal(xkey, (B, IN_FEATURES), jnp.float32)

    w1, b1, w2, b2 = init_params(pkey)
    w1_p, b1_p, w2_p, b2_p = prepare_params(w1, b1, w2, b2)

    out = fc_forward(x, w1_p, b1_p, w2_p, b2_p)
    out = jax.block_until_ready(out)

    # sanity: shape, softmax rows sum to 1, matches pure-JAX f32 reference
    assert out.shape == (B, OUT)
    assert jnp.allclose(jnp.sum(out, axis=1), 1.0, atol=1e-5)
    ref = reference_forward(x, w1, b1, w2, b2)
    assert jnp.allclose(out, ref, atol=2e-2), (out, ref)  # bf16 weight stream tolerance

    print("KERNEL_OK")
</pallas_src>

<mosaic_0001>
module attributes {stable_mosaic.version = 11 : i64} {
  func.func @fc_kernel(%arg0: i32, %arg1: memref<8x4096xbf16, #tpu.memory_space<vmem>>, %arg2: memref<4096x128xbf16, #tpu.memory_space<vmem>>, %arg3: memref<1x128xf32, #tpu.memory_space<vmem>>, %arg4: memref<128x4xf32, #tpu.memory_space<vmem>>, %arg5: memref<1x4xf32, #tpu.memory_space<vmem>>, %arg6: memref<8x4xf32, #tpu.memory_space<vmem>>, %arg7: memref<8x128xf32, #tpu.memory_space<vmem>>) attributes {dimension_semantics = [#tpu.dimension_semantics<arbitrary>], iteration_bounds = array<i64: 5>, scalar_prefetch = 0 : i64, scratch_operands = 1 : i64, tpu.core_type = #tpu.core_type<tc>, window_params = [{transform_indices = @transform_0, window_bounds = array<i64: 8, 4096>}, {transform_indices = @transform_1, window_bounds = array<i64: 4096, 128>}, {pipeline_mode = #tpu.pipeline_mode<synchronous>, transform_indices = @transform_2, window_bounds = array<i64: 1, 128>}, {pipeline_mode = #tpu.pipeline_mode<synchronous>, transform_indices = @transform_3, window_bounds = array<i64: 128, 4>}, {pipeline_mode = #tpu.pipeline_mode<synchronous>, transform_indices = @transform_4, window_bounds = array<i64: 1, 4>}, {pipeline_mode = #tpu.pipeline_mode<synchronous>, transform_indices = @transform_5, window_bounds = array<i64: 8, 4>}]} {
    %c0_i32 = arith.constant 0 : i32
    %0 = arith.cmpi eq, %arg0, %c0_i32 : i32
    %1 = arith.extui %0 : i1 to i32
    %c0_i32_0 = arith.constant 0 : i32
    %2 = arith.cmpi ne, %1, %c0_i32_0 : i32
    scf.if %2 {
      %cst_9 = arith.constant 0.000000e+00 : f32
      %12 = vector.broadcast %cst_9 : f32 to vector<8x128xf32>
      %c0_10 = arith.constant 0 : index
      %c0_11 = arith.constant 0 : index
      %13 = vector.load %arg7[%c0_10, %c0_11] : memref<8x128xf32, #tpu.memory_space<vmem>>, vector<8x128xf32>
      tpu.vector_store %arg7[%c0_10, %c0_11], %12 {strides = array<i32>} : memref<8x128xf32, #tpu.memory_space<vmem>>, vector<8x128xf32>,
    } else {
    }
    %c0 = arith.constant 0 : index
    %c0_1 = arith.constant 0 : index
    %3 = vector.load %arg7[%c0, %c0_1] : memref<8x128xf32, #tpu.memory_space<vmem>>, vector<8x128xf32>
    %c0_2 = arith.constant 0 : index
    %c0_3 = arith.constant 0 : index
    %4 = vector.load %arg1[%c0_2, %c0_3] : memref<8x4096xbf16, #tpu.memory_space<vmem>>, vector<8x4096xbf16>
    %c0_4 = arith.constant 0 : index
    %c0_5 = arith.constant 0 : index
    %5 = vector.load %arg2[%c0_4, %c0_5] : memref<4096x128xbf16, #tpu.memory_space<vmem>>, vector<4096x128xbf16>
    %cst = arith.constant dense<0.000000e+00> : vector<8x128xf32>
    %6 = tpu.matmul %4, %5, %cst {dimension_numbers = #tpu.dot_dimension_numbers<[1], [0], [0], [1], [0, 0, 1, 1], [], []>} : vector<8x4096xbf16>, vector<4096x128xbf16>, vector<8x128xf32> -> vector<8x128xf32>
    %7 = arith.addf %3, %6 : vector<8x128xf32>
    %c0_6 = arith.constant 0 : index
    %c0_7 = arith.constant 0 : index
    %8 = vector.load %arg7[%c0_6, %c0_7] : memref<8x128xf32, #tpu.memory_space<vmem>>, vector<8x128xf32>
    tpu.vector_store %arg7[%c0_6, %c0_7], %7 {strides = array<i32>} : memref<8x128xf32, #tpu.memory_space<vmem>>, vector<8x128xf32>,
    %c4_i32 = arith.constant 4 : i32
    %9 = arith.cmpi eq, %arg0, %c4_i32 : i32
    %10 = arith.extui %9 : i1 to i32
    %c0_i32_8 = arith.constant 0 : i32
    %11 = arith.cmpi ne, %10, %c0_i32_8 : i32
    scf.if %11 {
      %c0_9 = arith.constant 0 : index
      %c0_10 = arith.constant 0 : index
      %12 = vector.load %arg7[%c0_9, %c0_10] : memref<8x128xf32, #tpu.memory_space<vmem>>, vector<8x128xf32>
      %c0_11 = arith.constant 0 : index
      %c0_12 = arith.constant 0 : index
      %13 = vector.load %arg3[%c0_11, %c0_12] : memref<1x128xf32, #tpu.memory_space<vmem>>, vector<1x128xf32>
      %14 = vector.broadcast %13 : vector<1x128xf32> to vector<8x128xf32>
      %15 = arith.addf %12, %14 : vector<8x128xf32>
      %c0_13 = arith.constant 0 : index
      %c0_14 = arith.constant 0 : index
      %16 = vector.load %arg4[%c0_13, %c0_14] : memref<128x4xf32, #tpu.memory_space<vmem>>, vector<128x4xf32>
      %cst_15 = arith.constant dense<0.000000e+00> : vector<8x4xf32>
      %17 = tpu.matmul %15, %16, %cst_15 {dimension_numbers = #tpu.dot_dimension_numbers<[1], [0], [0], [1], [0, 0, 1, 1], [], []>} : vector<8x128xf32>, vector<128x4xf32>, vector<8x4xf32> -> vector<8x4xf32>
      %c0_16 = arith.constant 0 : index
      %c0_17 = arith.constant 0 : index
      %18 = vector.load %arg5[%c0_16, %c0_17] : memref<1x4xf32, #tpu.memory_space<vmem>>, vector<1x4xf32>
      %19 = vector.broadcast %18 : vector<1x4xf32> to vector<8x4xf32>
      %20 = arith.addf %17, %19 : vector<8x4xf32>
      %cst_18 = arith.constant dense<0xFF800000> : vector<8xf32>
      %21 = vector.multi_reduction <maximumf>, %20, %cst_18 [1] : vector<8x4xf32> to vector<8xf32>
      %22 = vector.shape_cast %21 : vector<8xf32> to vector<8x1xf32>
      %23 = vector.broadcast %22 : vector<8x1xf32> to vector<8x4xf32>
      %24 = arith.subf %20, %23 : vector<8x4xf32>
      %25 = math.exp %24 : vector<8x4xf32>
      %cst_19 = arith.constant dense<0.000000e+00> : vector<8xf32>
      %26 = vector.multi_reduction <add>, %25, %cst_19 [1] : vector<8x4xf32> to vector<8xf32>
      %27 = vector.shape_cast %26 : vector<8xf32> to vector<8x1xf32>
      %28 = vector.broadcast %27 : vector<8x1xf32> to vector<8x4xf32>
      %29 = arith.divf %25, %28 : vector<8x4xf32>
      %c0_20 = arith.constant 0 : index
      %c0_21 = arith.constant 0 : index
      %30 = vector.load %arg6[%c0_20, %c0_21] : memref<8x4xf32, #tpu.memory_space<vmem>>, vector<8x4xf32>
      tpu.vector_store %arg6[%c0_20, %c0_21], %29 {strides = array<i32>} : memref<8x4xf32, #tpu.memory_space<vmem>>, vector<8x4xf32>,
    } else {
    }
    return
  }
  func.func @transform_0(%arg0: i32) -> (i32, i32) {
    %c0_i32 = arith.constant 0 : i32
    %c0_i32_0 = arith.constant 0 : i32
    return %c0_i32, %arg0 : i32, i32
  }
  func.func @transform_1(%arg0: i32) -> (i32, i32) {
    %c0_i32 = arith.constant 0 : i32
    %c0_i32_0 = arith.constant 0 : i32
    return %arg0, %c0_i32 : i32, i32
  }
  func.func @transform_2(%arg0: i32) -> (i32, i32) {
    %c0_i32 = arith.constant 0 : i32
    %c0_i32_0 = arith.constant 0 : i32
    %c0_i32_1 = arith.constant 0 : i32
    return %c0_i32, %c0_i32_0 : i32, i32
  }
  func.func @transform_3(%arg0: i32) -> (i32, i32) {
    %c0_i32 = arith.constant 0 : i32
    %c0_i32_0 = arith.constant 0 : i32
    %c0_i32_1 = arith.constant 0 : i32
    return %c0_i32, %c0_i32_0 : i32, i32
  }
  func.func @transform_4(%arg0: i32) -> (i32, i32) {
    %c0_i32 = arith.constant 0 : i32
    %c0_i32_0 = arith.constant 0 : i32
    %c0_i32_1 = arith.constant 0 : i32
    return %c0_i32, %c0_i32_0 : i32, i32
  }
  func.func @transform_5(%arg0: i32) -> (i32, i32) {
    %c0_i32 = arith.constant 0 : i32
    %c0_i32_0 = arith.constant 0 : i32
    %c0_i32_1 = arith.constant 0 : i32
    return %c0_i32, %c0_i32_0 : i32, i32
  }
}

</mosaic_0001>

<bundles_post_ra>
// kernel: fc_forward.1
= control target key start
LH: loop header
LB: loop body
LE: loop exit
PB: predicated region body
PF: predicated region fallthrough
CT: control target
= control target key end

     0   :  { %10 = vsyncpa [#allocation4], 0  ;;  %s5014_s0 = inlined_call_operand.vmem [shape: bf16[8,20480], index: 0, kind: input, shape index: {}]   ;;  %s5015_s1 = inlined_call_operand.hbm [shape: bf16[20480,128], index: 1, kind: input, shape index: {}]   ;;  %s5016_s2 = inlined_call_operand.hbm [shape: f32[1,128], index: 2, kind: input, shape index: {}]   ;;  %s5017_s3 = inlined_call_operand.vmem [shape: f32[128,4], index: 3, kind: input, shape index: {}]   ;;  %s5018_s4 = inlined_call_operand.hbm [shape: f32[1,4], index: 4, kind: input, shape index: {}]   ;;  %s5019_s5 = inlined_call_operand.vmem [shape: f32[8,4], index: 5, kind: output, shape index: {}]  }
   0x1   :  { %12 = vsyncpa [#allocation4 + $0x1], 0 }
   0x2   :  { %13 = vsyncpa [#allocation6], 0  ;;  %s4563_s18 = smov 0   ;;  %s4565_s19 = smov 0  }
   0x3   :  { %s4567_s20 = smov 0   ;;  %s4569_s21 = smov 0  }
   0x4 LB: > { %s4582_s22 = sadd.s32 4294967295, %s4526_s21   ;;  %s4585_s23 = sadd.s32 1, %s4526_s21   ;;  %s4526_s21 = sphi %s4569_s21, %s5027_s21   ;;  %s4522_s20 = sphi %s4567_s20, %s5026_s20   ;;  %s4518_s19 = sphi %s4565_s19, %s5025_s19   ;;  %s4514_s18 = sphi %s4563_s18, %s5024_s18  }
   0x5   : > { %s49_s24 = ssub.s32 %s4526_s21, %s4585_s23  ;;  %s52_s25 = sadd.s32 1, %s4522_s20 }
   0x6   : > { %p50_p0 = scmp.eq.s32.totalorder %s49_s24, 0  ;;  %p59_p1 = scmp.ne.s32.totalorder %s4522_s20, %s4518_s19 }
   0x7   : > { %p60_p2 = scmp.eq.s32.totalorder %s4526_s21, 0  ;;  %p65_p3 = scmp.ne.s32.totalorder %s4518_s19, %s4514_s18 }
   0x8   : > { %s4595_s26 = scalar_select %p50_p0, %s4522_s20, %s52_s25  }
   0x9   : > { %p4597_p4 = por %p60_p2, %p59_p1  ;;  %p66_p5 = scmp.eq.s32.totalorder %s4582_s22, 0 }
   0xa   : > { %p3031_p6 = scmp.ge.s32.totalorder %s4526_s21, 1  ;;  %p160_p7 = scmp.lt.s32.totalorder %s4526_s21, 6 }
   0xb   : > { %p4606_p8 = por %p66_p5, %p65_p3  ;;  %p3032_p9 = scmp.ne.s32.totalorder %s4582_s22, 0 }
   0xc   : > { %p4611_p10 = pnand %p3031_p6, %p160_p7  ;;  %s172_s7 = sshll.u32 %s5016_s2, 4  ;;  %s173_s7 = int_to_ptr.hbm [resolvable:$true] %s172_s7 }
   0xd   : > { %s4528_s8 = smov [#allocation5]   ;;  %p4352_p13 = scmp.lt.s32.totalorder %s4526_s21, 5 }
   0xe   : > { %p4339_p11 = pneg %p4611_p10  ;;  %s174_s9 = sshll.u32 %s4528_s8, 4  ;;  %s175_s9 = int_to_ptr.vmem [resolvable:$true] %s174_s9 }
   0xf   : > { %s187_s12 = sshll.u32 %s5018_s4, 4  ;;  %p4628_p0 = pnand %p4352_p13, %p4597_p4  ;;  %s188_s12 = int_to_ptr.hbm [resolvable:$true] %s187_s12 }
  0x10   : > { %p4340_p12 = pnand %p4339_p11, %p66_p5  ;;  %s4529_s14 = smov [#allocation7]  }
  0x11   : > { %s189_s15 = sshll.u32 %s4529_s14, 4  ;;  %s209_s16 = sand.u32 1, %s4522_s20   ;;  %s190_s15 = int_to_ptr.vmem [resolvable:$true] %s189_s15 }
  0x12   : > { %4342 = dma.hbm_to_vmem [thread:$0]  (!%p4340_p12), %s173_s7, 16, %s175_s9, [#allocation6]  }
  0x13   : > { %4345 = dma.hbm_to_vmem [thread:$0]  (!%p4340_p12), %s188_s12, 16, %s190_s15, [#allocation6]  }
  0x14   : > { %s3035_s17 = sshll.u32 %s209_s16, 11  ;;  %s4072_s18 = sshll.u32 %s4526_s21, 11 }
  0x15   : > { %s218_s30 = scalar_lea.hbm %s5015_s1, %s4072_s18  ;;  %s213_s27 = scalar_lea.vmem [#allocation3], %s3035_s17 }
  0x16   : > { %s219_s6 = sshll.u32 %s218_s30, 4  ;;  %s221_s8 = sshll.u32 %s213_s27, 4  ;;  %s220_s6 = int_to_ptr.hbm [resolvable:$true] %s219_s6  ;;  %s222_s8 = int_to_ptr.vmem [resolvable:$true] %s221_s8 }
  0x17   : > { %s210_s10 = scalar_lea.sflag [#allocation4], %s209_s16  ;;  %s4458_s7 = sshra.s32 %s220_s6, 4  ;;  %s4459_s7 = int_to_ptr.hbm [resolvable:$true] %s4458_s7 }
  0x18   : > { %s4460_s9 = scalar_lea.hbm %s4459_s7, 2048  ;;  %p4462_p2 = pneg %p4628_p0 }
  0x19   : > { %p4461_p1 = scmp.ne.s32.totalorder %s4459_s7, %s4460_s9  ;;  %s4465_s12 = scalar_lea.hbm %s5015_s1, 10240 }
  0x1a   : > { %p4466_p6 = scmp.lt.s32.totalorder %s4459_s7, %s5015_s1  ;;  %p4467_p7 = scmp.lt.s32.totalorder %s4465_s12, %s4460_s9 }
  0x1b   : > { %p4463_p3 = pnand %p4462_p2, %p4461_p1 }
  0x1c   : > { %p4468_p11 = por %p4467_p7, %p4466_p6 }
  0x1d   : > { %p4464_p4 = pneg %p4463_p3 }
  0x1f   : > { %p4469_p12 = pnand %p4468_p11, %p4464_p4 }
  0x21   : > { %4472 = shalt.err (!%p4469_p12)
}
  0x22   : > { %s4530_s16 = smov 64   ;;  %s4531_s17 = smov 4  }
  0x23   : > { %4349 = dma.hbm_to_vmem [thread:$0]  (!%p4628_p0), %s220_s6, 32768, %s222_s8, %s210_s10, %s4530_s16, %s4530_s16, %s4531_s17  }
  0x24   : > { %233 = sbr.rel (%p4611_p10) target bundleno = 876 (0x36c), region = 40  ;;  %s235_s18 = sand.u32 (!%p4611_p10), 1, %s4518_s19  }
  0x25   : > { %s3039_s24 = sshll.u32 (!%p4611_p10), %s235_s18, 11  ;;  %s236_s25 = scalar_lea.sflag (!%p4611_p10), [#allocation4], %s235_s18 }
  0x26   : > { %s4650_s30 = scalar_lea.vmem (!%p4611_p10), [#allocation3], %s3039_s24 }
  0x29   : > { %4505 = dma.done.wait (%p4606_p8), %s236_s25, 32768  }
  0x2a   : > { %4507 = vsyncadd (%p4606_p8), %s236_s25, 4294934528 }
  0x2b   : > { %4509 = dma.done.wait (%p66_p5), [#allocation6], 32  }
  0x2c   : > { %4511 = vsyncadd (%p66_p5), [#allocation6], 4294967264  ;;  %s3042_s29 = sshll.u32 %s4582_s22, 5 }
  0x2d   : > { %p278_p10 = scmp.lt.s32.totalorder %s3042_s29, 159  ;;  %287 = sbr.rel (%p3032_p9) target bundleno = 52 (0x34), region = 56 }
  0x2f   : > { %s5029_s29 = smov (!%p278_p10, %s3042_s29), 159 }
  0x30   : > { %s3043_s13 = sshll.u32 %s5029_s29, 2 }
  0x31   : > { %s4664_s8 = scalar_lea.vmem %s5014_s0, %s3043_s13 }
  0x32   : > { %v4532_v0 = vmov 0.0  }
  0x33   : > { %288 = vst [vmem:[#allocation2] sm:$0xff] %v4532_v0 }
  0x34 PF: > { %v4080_v1 = vld [vmem:[%s4650_s30 + $0x38] sm:$0xff]  ;;  %v4079_v5 = vld [vmem:[%s4650_s30 + $0x30] sm:$0xff]  ;;  %v4078_v9 = vld [vmem:[%s4650_s30 + $0x28] sm:$0xff]  ;;  %p4069_p5 = scmp.ne.s32.totalorder %s4582_s22, 4 }
  0x35   : > { %v4088_v2 = vld [vmem:[%s4650_s30 + $0x78] sm:$0xff]  ;;  %2466 = vmatpush.bf16.msra.mxu0 %v4080_v1  ;;  %v4087_v6 = vld [vmem:[%s4650_s30 + $0x70] sm:$0xff]  ;;  %v4086_v10 = vld [vmem:[%s4650_s30 + $0x68] sm:$0xff] }
  0x36   : > { %v4096_v3 = vld [vmem:[%s4650_s30 + $0xb8] sm:$0xff]  ;;  %2479 = vmatpush.bf16.msra.mxu1 %v4088_v2  ;;  %v4095_v7 = vld [vmem:[%s4650_s30 + $0xb0] sm:$0xff]  ;;  %v4094_v11 = vld [vmem:[%s4650_s30 + $0xa8] sm:$0xff] }
  0x37   : > { %v4104_v4 = vld [vmem:[%s4650_s30 + $0xf8] sm:$0xff]  ;;  %2492 = vmatpush.bf16.msra.mxu2 %v4096_v3  ;;  %v4103_v8 = vld [vmem:[%s4650_s30 + $0xf0] sm:$0xff]  ;;  %v4102_v12 = vld [vmem:[%s4650_s30 + $0xe8] sm:$0xff] }
  0x38   : > { %2505 = vmatpush.bf16.msra.mxu3 %v4104_v4  ;;  %v4077_v13 = vld [vmem:[%s4650_s30 + $0x20] sm:$0xff]  ;;  %v4076_v17 = vld [vmem:[%s4650_s30 + $0x18] sm:$0xff]  ;;  %v4075_v21 = vld [vmem:[%s4650_s30 + $0x10] sm:$0xff] }
  0x39   : > { %2467 = vmatpush.bf16.msra.mxu0 %v4079_v5  ;;  %v4085_v14 = vld [vmem:[%s4650_s30 + $0x60] sm:$0xff]  ;;  %v4084_v18 = vld [vmem:[%s4650_s30 + $0x58] sm:$0xff]  ;;  %v4083_v22 = vld [vmem:[%s4650_s30 + $0x50] sm:$0xff] }
  0x3a   : > { %2480 = vmatpush.bf16.msra.mxu1 %v4087_v6  ;;  %v4093_v15 = vld [vmem:[%s4650_s30 + $0xa0] sm:$0xff]  ;;  %v4092_v19 = vld [vmem:[%s4650_s30 + $0x98] sm:$0xff]  ;;  %v4091_v23 = vld [vmem:[%s4650_s30 + $0x90] sm:$0xff] }
  0x3b   : > { %2493 = vmatpush.bf16.msra.mxu2 %v4095_v7  ;;  %v4101_v16 = vld [vmem:[%s4650_s30 + $0xe0] sm:$0xff]  ;;  %v4100_v20 = vld [vmem:[%s4650_s30 + $0xd8] sm:$0xff]  ;;  %v4099_v24 = vld [vmem:[%s4650_s30 + $0xd0] sm:$0xff] }
  0x3c   : > { %2506 = vmatpush.bf16.msra.mxu3 %v4103_v8  ;;  %v4074_v25 = vld [vmem:[%s4650_s30 + $0x8] sm:$0xff]  ;;  %v291_v29 = vld [vmem:[%s4664_s8 + $0x8] sm:$0xff]  ;;  %v290_v30 = vld [vmem:[%s4664_s8] sm:$0xff] }
  0x3d   : > { %2468 = vmatpush.bf16.msra.mxu0 %v4078_v9  ;;  %v4082_v26 = vld [vmem:[%s4650_s30 + $0x48] sm:$0xff]  ;;  %v4073_v31 = vld [vmem:[%s4650_s30] sm:$0xff]  ;;  %v836_v33 = vunpack.c.l.b16 %v291_v29  ;;  %v834_v34 = vunpack.c.l.b16 %v290_v30  ;;  %v837_v37 = vunpack.c.h.b16 %v291_v29  ;;  %v835_v38 = vunpack.c.h.b16 %v290_v30  ;;  %v4112_v39 = vld [vmem:[%s4650_s30 + $0x138] sm:$0xff] }
  0x3e   : > { %2481 = vmatpush.bf16.msra.mxu1 %v4086_v10  ;;  %v4090_v27 = vld [vmem:[%s4650_s30 + $0x88] sm:$0xff]  ;;  %v4081_v32 = vld [vmem:[%s4650_s30 + $0x40] sm:$0xff]  ;;  %v4120_v40 = vld [vmem:[%s4650_s30 + $0x178] sm:$0xff] }
  0x3f   : > { %2494 = vmatpush.bf16.msra.mxu2 %v4094_v11  ;;  %v4098_v28 = vld [vmem:[%s4650_s30 + $0xc8] sm:$0xff]  ;;  %v4089_v35 = vld [vmem:[%s4650_s30 + $0x80] sm:$0xff]  ;;  %v4128_v41 = vld [vmem:[%s4650_s30 + $0x1b8] sm:$0xff]  ;;  %v868_v43 = vpack.c.b16 %v836_v33, %v836_v33  ;;  %v866_v44 = vpack.c.b16 %v834_v34, %v834_v34  ;;  %v869_v45 = vpack.c.b16 %v837_v37, %v837_v37  ;;  %v867_v46 = vpack.c.b16 %v835_v38, %v835_v38 }
  0x40   : > { %2507 = vmatpush.bf16.msra.mxu3 %v4102_v12  ;;  %v4097_v36 = vld [vmem:[%s4650_s30 + $0xc0] sm:$0xff]  ;;  %v4136_v42 = vld [vmem:[%s4650_s30 + $0x1f8] sm:$0xff]  ;;  %v4111_v47 = vld [vmem:[%s4650_s30 + $0x130] sm:$0xff] }
  0x41   : > { %2469 = vmatpush.bf16.msra.mxu0 %v4077_v13  ;;  %v4119_v48 = vld [vmem:[%s4650_s30 + $0x170] sm:$0xff]  ;;  %v4110_v51 = vld [vmem:[%s4650_s30 + $0x128] sm:$0xff]  ;;  %v4109_v55 = vld [vmem:[%s4650_s30 + $0x120] sm:$0xff] }
  0x42   : > { %2482 = vmatpush.bf16.msra.mxu1 %v4085_v14  ;;  %v4127_v49 = vld [vmem:[%s4650_s30 + $0x1b0] sm:$0xff]  ;;  %v4118_v52 = vld [vmem:[%s4650_s30 + $0x168] sm:$0xff]  ;;  %v4117_v56 = vld [vmem:[%s4650_s30 + $0x160] sm:$0xff] }
  0x43   : > { %2495 = vmatpush.bf16.msra.mxu2 %v4093_v15  ;;  %v4135_v50 = vld [vmem:[%s4650_s30 + $0x1f0] sm:$0xff]  ;;  %v4126_v53 = vld [vmem:[%s4650_s30 + $0x1a8] sm:$0xff]  ;;  %v4125_v57 = vld [vmem:[%s4650_s30 + $0x1a0] sm:$0xff] }
  0x44   : > { %2508 = vmatpush.bf16.msra.mxu3 %v4101_v16  ;;  %v4134_v54 = vld [vmem:[%s4650_s30 + $0x1e8] sm:$0xff]  ;;  %v4133_v58 = vld [vmem:[%s4650_s30 + $0x1e0] sm:$0xff]  ;;  %v4108_v59 = vld [vmem:[%s4650_s30 + $0x118] sm:$0xff] }
  0x45   : > { %2470 = vmatpush.bf16.msra.mxu0 %v4076_v17  ;;  %v4116_v60 = vld [vmem:[%s4650_s30 + $0x158] sm:$0xff]  ;;  %v4107_v63 = vld [vmem:[%s4650_s30 + $0x110] sm:$0xff]  ;;  %v4106_v3 = vld [vmem:[%s4650_s30 + $0x108] sm:$0xff] }
  0x46   : > { %2483 = vmatpush.bf16.msra.mxu1 %v4084_v18  ;;  %v4124_v61 = vld [vmem:[%s4650_s30 + $0x198] sm:$0xff]  ;;  %v4115_v0 = vld [vmem:[%s4650_s30 + $0x150] sm:$0xff]  ;;  %v4114_v4 = vld [vmem:[%s4650_s30 + $0x148] sm:$0xff] }
  0x47   : > { %2496 = vmatpush.bf16.msra.mxu2 %v4092_v19  ;;  %v4132_v62 = vld [vmem:[%s4650_s30 + $0x1d8] sm:$0xff]  ;;  %v4123_v1 = vld [vmem:[%s4650_s30 + $0x190] sm:$0xff]  ;;  %v4122_v5 = vld [vmem:[%s4650_s30 + $0x188] sm:$0xff] }
  0x48   : > { %2509 = vmatpush.bf16.msra.mxu3 %v4100_v20  ;;  %v4131_v2 = vld [vmem:[%s4650_s30 + $0x1d0] sm:$0xff]  ;;  %v4130_v6 = vld [vmem:[%s4650_s30 + $0x1c8] sm:$0xff]  ;;  %v4105_v9 = vld [vmem:[%s4650_s30 + $0x100] sm:$0xff] }
  0x49   : > { %2471 = vmatpush.bf16.msra.mxu0 %v4075_v21  ;;  %v293_v7 = vld [vmem:[%s4664_s8 + $0x18] sm:$0xff]  ;;  %v292_v8 = vld [vmem:[%s4664_s8 + $0x10] sm:$0xff]  ;;  %v4113_v10 = vld [vmem:[%s4650_s30 + $0x140] sm:$0xff] }
  0x4a   : > { %2484 = vmatpush.bf16.msra.mxu1 %v4083_v22  ;;  %v840_v11 = vunpack.c.l.b16 %v293_v7  ;;  %v838_v12 = vunpack.c.l.b16 %v292_v8  ;;  %v4121_v13 = vld [vmem:[%s4650_s30 + $0x180] sm:$0xff]  ;;  %v841_v15 = vunpack.c.h.b16 %v293_v7  ;;  %v839_v16 = vunpack.c.h.b16 %v292_v8  ;;  %v4144_v17 = vld [vmem:[%s4650_s30 + $0x238] sm:$0xff]  ;;  %v4142_v29 = vld [vmem:[%s4650_s30 + $0x228] sm:$0xff] }
  0x4b   : > { %2497 = vmatpush.bf16.msra.mxu2 %v4091_v23  ;;  %v4129_v14 = vld [vmem:[%s4650_s30 + $0x1c0] sm:$0xff]  ;;  %v4152_v18 = vld [vmem:[%s4650_s30 + $0x278] sm:$0xff]  ;;  %v4150_v30 = vld [vmem:[%s4650_s30 + $0x268] sm:$0xff] }
  0x4c   : > { %2510 = vmatpush.bf16.msra.mxu3 %v4099_v24  ;;  %v4160_v19 = vld [vmem:[%s4650_s30 + $0x2b8] sm:$0xff]  ;;  %v872_v21 = vpack.c.b16 %v840_v11, %v840_v11  ;;  %v870_v22 = vpack.c.b16 %v838_v12, %v838_v12  ;;  %v873_v23 = vpack.c.b16 %v841_v15, %v841_v15  ;;  %v871_v24 = vpack.c.b16 %v839_v16, %v839_v16  ;;  %v4141_v33 = vld [vmem:[%s4650_s30 + $0x220] sm:$0xff]  ;;  %v4174_v7 = vld [vmem:[%s4650_s30 + $0x328] sm:$0xff] }
  0x4d   : > { %2472 = vmatpush.bf16.msra.mxu0 %v4074_v25  ;;  %v4168_v20 = vld [vmem:[%s4650_s30 + $0x2f8] sm:$0xff]  ;;  %v4143_v25 = vld [vmem:[%s4650_s30 + $0x230] sm:$0xff]  ;;  %v4149_v34 = vld [vmem:[%s4650_s30 + $0x260] sm:$0xff] }
  0x4e   : > { %2485 = vmatpush.bf16.msra.mxu1 %v4082_v26  ;;  %v4151_v26 = vld [vmem:[%s4650_s30 + $0x270] sm:$0xff]  ;;  %v4140_v37 = vld [vmem:[%s4650_s30 + $0x218] sm:$0xff]  ;;  %v4182_v8 = vld [vmem:[%s4650_s30 + $0x368] sm:$0xff] }
  0x4f   : > { %2498 = vmatpush.bf16.msra.mxu2 %v4090_v27  ;;  %v4159_v27 = vld [vmem:[%s4650_s30 + $0x2b0] sm:$0xff]  ;;  %v4148_v38 = vld [vmem:[%s4650_s30 + $0x258] sm:$0xff]  ;;  %v4173_v11 = vld [vmem:[%s4650_s30 + $0x320] sm:$0xff] }
  0x50   : > { %2511 = vmatpush.bf16.msra.mxu3 %v4098_v28  ;;  %v4167_v28 = vld [vmem:[%s4650_s30 + $0x2f0] sm:$0xff]  ;;  %v4181_v12 = vld [vmem:[%s4650_s30 + $0x360] sm:$0xff]  ;;  %v4172_v15 = vld [vmem:[%s4650_s30 + $0x318] sm:$0xff] }
  0x51   : > { %2473 = vmatpush.bf16.msra.mxu0 %v4073_v31  ;;  %v4158_v31 = vld [vmem:[%s4650_s30 + $0x2a8] sm:$0xff]  ;;  %v4180_v16 = vld [vmem:[%s4650_s30 + $0x358] sm:$0xff] }
  0x52   : > { %2486 = vmatpush.bf16.msra.mxu1 %v4081_v32  ;;  %v4166_v32 = vld [vmem:[%s4650_s30 + $0x2e8] sm:$0xff] }
  0x53   : > { %2499 = vmatpush.bf16.msra.mxu2 %v4089_v35  ;;  %v4157_v35 = vld [vmem:[%s4650_s30 + $0x2a0] sm:$0xff] }
  0x54   : > { %2512 = vmatpush.bf16.msra.mxu3 %v4097_v36  ;;  %2474 = vmatmul.bf16.vlgmr.msra.gmra.mxu0 %v866_v44  ;;  %v4165_v36 = vld [vmem:[%s4650_s30 + $0x2e0] sm:$0xff]  ;;  %v4163_v44 = vld [vmem:[%s4650_s30 + $0x2d0] sm:$0xff] }
  0x55   : > { %2518 = vmatpush.bf16.msrb.mxu0 %v4112_v39  ;;  %2487 = vmatmul.bf16.vlgmr.msra.gmra.mxu1 %v867_v46  ;;  %v4156_v39 = vld [vmem:[%s4650_s30 + $0x298] sm:$0xff]  ;;  %v4146_v46 = vld [vmem:[%s4650_s30 + $0x248] sm:$0xff] }
  0x56   : > { %2531 = vmatpush.bf16.msrb.mxu1 %v4120_v40  ;;  %2500 = vmatmul.bf16.vlgmr.msra.gmra.mxu2 %v868_v43  ;;  %v4164_v40 = vld [vmem:[%s4650_s30 + $0x2d8] sm:$0xff]  ;;  %v4155_v43 = vld [vmem:[%s4650_s30 + $0x290] sm:$0xff] }
  0x57   : > { %2544 = vmatpush.bf16.msrb.mxu2 %v4128_v41  ;;  %2513 = vmatmul.bf16.vlgmr.msra.gmra.mxu3 %v869_v45  ;;  %v4139_v41 = vld [vmem:[%s4650_s30 + $0x210] sm:$0xff]  ;;  %v4138_v45 = vld [vmem:[%s4650_s30 + $0x208] sm:$0xff] }
  0x58   : > { %2557 = vmatpush.bf16.msrb.mxu3 %v4136_v42  ;;  %v4147_v42 = vld [vmem:[%s4650_s30 + $0x250] sm:$0xff] }
  0x59   : > { %2519 = vmatpush.bf16.msrb.mxu0 %v4111_v47  ;;  %v4154_v47 = vld [vmem:[%s4650_s30 + $0x288] sm:$0xff] }
  0x5a   : > { %2532 = vmatpush.bf16.msrb.mxu1 %v4119_v48  ;;  %v4162_v48 = vld [vmem:[%s4650_s30 + $0x2c8] sm:$0xff] }
  0x5b   : > { %2545 = vmatpush.bf16.msrb.mxu2 %v4127_v49  ;;  %v294_v49 = vld [vmem:[%s4664_s8 + $0x20] sm:$0xff] }
  0x5c   : > { %2558 = vmatpush.bf16.msrb.mxu3 %v4135_v50  ;;  %v295_v50 = vld [vmem:[%s4664_s8 + $0x28] sm:$0xff] }
  0x5d   : > { %2520 = vmatpush.bf16.msrb.mxu0 %v4110_v51  ;;  %v4137_v51 = vld [vmem:[%s4650_s30 + $0x200] sm:$0xff] }
  0x5e   : > { %2533 = vmatpush.bf16.msrb.mxu1 %v4118_v52  ;;  %v4145_v52 = vld [vmem:[%s4650_s30 + $0x240] sm:$0xff] }
  0x5f   : > { %2546 = vmatpush.bf16.msrb.mxu2 %v4126_v53  ;;  %v842_v53 = vunpack.c.l.b16 %v294_v49 }
  0x60   : > { %2559 = vmatpush.bf16.msrb.mxu3 %v4134_v54  ;;  %v844_v54 = vunpack.c.l.b16 %v295_v50 }
  0x61   : > { %2521 = vmatpush.bf16.msrb.mxu0 %v4109_v55  ;;  %v4153_v55 = vld [vmem:[%s4650_s30 + $0x280] sm:$0xff] }
  0x62   : > { %2534 = vmatpush.bf16.msrb.mxu1 %v4117_v56  ;;  %v4161_v56 = vld [vmem:[%s4650_s30 + $0x2c0] sm:$0xff] }
  0x63   : > { %2547 = vmatpush.bf16.msrb.mxu2 %v4125_v57  ;;  %v843_v57 = vunpack.c.h.b16 %v294_v49  ;;  %v4206_v49 = vld [vmem:[%s4650_s30 + $0x428] sm:$0xff] }
  0x64   : > { %2560 = vmatpush.bf16.msrb.mxu3 %v4133_v58  ;;  %v845_v58 = vunpack.c.h.b16 %v295_v50  ;;  %v4214_v50 = vld [vmem:[%s4650_s30 + $0x468] sm:$0xff] }
  0x65   : > { %2522 = vmatpush.bf16.msrb.mxu0 %v4108_v59  ;;  %v4176_v59 = vld [vmem:[%s4650_s30 + $0x338] sm:$0xff] }
  0x66   : > { %2535 = vmatpush.bf16.msrb.mxu1 %v4116_v60  ;;  %v4184_v60 = vld [vmem:[%s4650_s30 + $0x378] sm:$0xff] }
  0x67   : > { %2548 = vmatpush.bf16.msrb.mxu2 %v4124_v61  ;;  %v4192_v61 = vld [vmem:[%s4650_s30 + $0x3b8] sm:$0xff] }
  0x68   : > { %2561 = vmatpush.bf16.msrb.mxu3 %v4132_v62  ;;  %v4200_v62 = vld [vmem:[%s4650_s30 + $0x3f8] sm:$0xff] }
  0x69   : > { %2523 = vmatpush.bf16.msrb.mxu0 %v4107_v63  ;;  %v874_v63 = vpack.c.b16 %v842_v53, %v842_v53  ;;  %v4205_v53 = vld [vmem:[%s4650_s30 + $0x420] sm:$0xff] }
  0x6a   : > { %2536 = vmatpush.bf16.msrb.mxu1 %v4115_v0  ;;  %v876_v0 = vpack.c.b16 %v844_v54, %v844_v54  ;;  %v4213_v54 = vld [vmem:[%s4650_s30 + $0x460] sm:$0xff] }
  0x6b   : > { %2549 = vmatpush.bf16.msrb.mxu2 %v4123_v1  ;;  %v875_v1 = vpack.c.b16 %v843_v57, %v843_v57  ;;  %v4204_v57 = vld [vmem:[%s4650_s30 + $0x418] sm:$0xff] }
  0x6c   : > { %2562 = vmatpush.bf16.msrb.mxu3 %v4131_v2  ;;  %v877_v2 = vpack.c.b16 %v845_v58, %v845_v58  ;;  %v4212_v58 = vld [vmem:[%s4650_s30 + $0x458] sm:$0xff] }
  0x6d   : > { %2524 = vmatpush.bf16.msrb.mxu0 %v4106_v3  ;;  %v4175_v3 = vld [vmem:[%s4650_s30 + $0x330] sm:$0xff] }
  0x6e   : > { %2537 = vmatpush.bf16.msrb.mxu1 %v4114_v4  ;;  %v4183_v4 = vld [vmem:[%s4650_s30 + $0x370] sm:$0xff] }
  0x6f   : > { %2550 = vmatpush.bf16.msrb.mxu2 %v4122_v5  ;;  %v4191_v5 = vld [vmem:[%s4650_s30 + $0x3b0] sm:$0xff] }
  0x70   : > { %2563 = vmatpush.bf16.msrb.mxu3 %v4130_v6  ;;  %v4199_v6 = vld [vmem:[%s4650_s30 + $0x3f0] sm:$0xff] }
  0x71   : > { %2525 = vmatpush.bf16.msrb.mxu0 %v4105_v9  ;;  %v4190_v9 = vld [vmem:[%s4650_s30 + $0x3a8] sm:$0xff] }
  0x72   : > { %2538 = vmatpush.bf16.msrb.mxu1 %v4113_v10  ;;  %v4198_v10 = vld [vmem:[%s4650_s30 + $0x3e8] sm:$0xff] }
  0x73   : > { %2551 = vmatpush.bf16.msrb.mxu2 %v4121_v13  ;;  %v4189_v13 = vld [vmem:[%s4650_s30 + $0x3a0] sm:$0xff] }
  0x74   : > { %2564 = vmatpush.bf16.msrb.mxu3 %v4129_v14  ;;  %2526 = vmatmul.bf16.vlgmr.msrb.gmra.mxu0 %v870_v22  ;;  %v4197_v14 = vld [vmem:[%s4650_s30 + $0x3e0] sm:$0xff]  ;;  %v4195_v22 = vld [vmem:[%s4650_s30 + $0x3d0] sm:$0xff] }
  0x75   : > { %2570 = vmatpush.bf16.msra.mxu0 %v4144_v17  ;;  %2539 = vmatmul.bf16.vlgmr.msrb.gmra.mxu1 %v871_v24  ;;  %v4188_v17 = vld [vmem:[%s4650_s30 + $0x398] sm:$0xff]  ;;  %v4178_v24 = vld [vmem:[%s4650_s30 + $0x348] sm:$0xff] }
  0x76   : > { %2583 = vmatpush.bf16.msra.mxu1 %v4152_v18  ;;  %2552 = vmatmul.bf16.vlgmr.msrb.gmra.mxu2 %v872_v21  ;;  %v4196_v18 = vld [vmem:[%s4650_s30 + $0x3d8] sm:$0xff]  ;;  %v4187_v21 = vld [vmem:[%s4650_s30 + $0x390] sm:$0xff] }
  0x77   : > { %2596 = vmatpush.bf16.msra.mxu2 %v4160_v19  ;;  %2565 = vmatmul.bf16.vlgmr.msrb.gmra.mxu3 %v873_v23  ;;  %v4171_v19 = vld [vmem:[%s4650_s30 + $0x310] sm:$0xff]  ;;  %v4170_v23 = vld [vmem:[%s4650_s30 + $0x308] sm:$0xff] }
  0x78   : > { %2609 = vmatpush.bf16.msra.mxu3 %v4168_v20  ;;  %v4179_v20 = vld [vmem:[%s4650_s30 + $0x350] sm:$0xff] }
  0x79   : > { %2571 = vmatpush.bf16.msra.mxu0 %v4143_v25  ;;  %v4186_v25 = vld [vmem:[%s4650_s30 + $0x388] sm:$0xff] }
  0x7a   : > { %2584 = vmatpush.bf16.msra.mxu1 %v4151_v26  ;;  %v4194_v26 = vld [vmem:[%s4650_s30 + $0x3c8] sm:$0xff] }
  0x7b   : > { %2597 = vmatpush.bf16.msra.mxu2 %v4159_v27  ;;  %v296_v27 = vld [vmem:[%s4664_s8 + $0x30] sm:$0xff] }
  0x7c   : > { %2610 = vmatpush.bf16.msra.mxu3 %v4167_v28  ;;  %v297_v28 = vld [vmem:[%s4664_s8 + $0x38] sm:$0xff] }
  0x7d   : > { %2572 = vmatpush.bf16.msra.mxu0 %v4142_v29  ;;  %v4169_v29 = vld [vmem:[%s4650_s30 + $0x300] sm:$0xff] }
  0x7e   : > { %2585 = vmatpush.bf16.msra.mxu1 %v4150_v30  ;;  %v4177_v30 = vld [vmem:[%s4650_s30 + $0x340] sm:$0xff] }
  0x7f   : > { %2598 = vmatpush.bf16.msra.mxu2 %v4158_v31  ;;  %v846_v31 = vunpack.c.l.b16 %v296_v27 }
  0x80   : > { %2611 = vmatpush.bf16.msra.mxu3 %v4166_v32  ;;  %v848_v32 = vunpack.c.l.b16 %v297_v28 }
  0x81   : > { %2573 = vmatpush.bf16.msra.mxu0 %v4141_v33  ;;  %v4185_v33 = vld [vmem:[%s4650_s30 + $0x380] sm:$0xff] }
  0x82   : > { %2586 = vmatpush.bf16.msra.mxu1 %v4149_v34  ;;  %v4193_v34 = vld [vmem:[%s4650_s30 + $0x3c0] sm:$0xff] }
  0x83   : > { %2599 = vmatpush.bf16.msra.mxu2 %v4157_v35  ;;  %v847_v35 = vunpack.c.h.b16 %v296_v27  ;;  %v4238_v27 = vld [vmem:[%s4650_s30 + $0x528] sm:$0xff] }
  0x84   : > { %2612 = vmatpush.bf16.msra.mxu3 %v4165_v36  ;;  %v849_v36 = vunpack.c.h.b16 %v297_v28  ;;  %v4246_v28 = vld [vmem:[%s4650_s30 + $0x568] sm:$0xff] }
  0x85   : > { %2574 = vmatpush.bf16.msra.mxu0 %v4140_v37  ;;  %v4208_v37 = vld [vmem:[%s4650_s30 + $0x438] sm:$0xff] }
  0x86   : > { %2587 = vmatpush.bf16.msra.mxu1 %v4148_v38  ;;  %v4216_v38 = vld [vmem:[%s4650_s30 + $0x478] sm:$0xff] }
  0x87   : > { %2600 = vmatpush.bf16.msra.mxu2 %v4156_v39  ;;  %v4224_v39 = vld [vmem:[%s4650_s30 + $0x4b8] sm:$0xff] }
  0x88   : > { %2613 = vmatpush.bf16.msra.mxu3 %v4164_v40  ;;  %v4232_v40 = vld [vmem:[%s4650_s30 + $0x4f8] sm:$0xff] }
  0x89   : > { %2575 = vmatpush.bf16.msra.mxu0 %v4139_v41  ;;  %v878_v41 = vpack.c.b16 %v846_v31, %v846_v31 }
  0x8a   : > { %2588 = vmatpush.bf16.msra.mxu1 %v4147_v42  ;;  %v880_v42 = vpack.c.b16 %v848_v32, %v848_v32  ;;  %v4237_v32 = vld [vmem:[%s4650_s30 + $0x520] sm:$0xff] }
  0x8b   : > { %2601 = vmatpush.bf16.msra.mxu2 %v4155_v43  ;;  %v879_v43 = vpack.c.b16 %v847_v35, %v847_v35  ;;  %v4253_v35 = vld [vmem:[%s4650_s30 + $0x5a0] sm:$0xff] }
  0x8c   : > { %2614 = vmatpush.bf16.msra.mxu3 %v4163_v44  ;;  %v881_v44 = vpack.c.b16 %v849_v36, %v849_v36  ;;  %v4261_v36 = vld [vmem:[%s4650_s30 + $0x5e0] sm:$0xff] }
  0x8d   : > { %2576 = vmatpush.bf16.msra.mxu0 %v4138_v45  ;;  %v4207_v45 = vld [vmem:[%s4650_s30 + $0x430] sm:$0xff] }
  0x8e   : > { %2589 = vmatpush.bf16.msra.mxu1 %v4146_v46  ;;  %v4215_v46 = vld [vmem:[%s4650_s30 + $0x470] sm:$0xff] }
  0x8f   : > { %2602 = vmatpush.bf16.msra.mxu2 %v4154_v47  ;;  %v4223_v47 = vld [vmem:[%s4650_s30 + $0x4b0] sm:$0xff] }
  0x90   : > { %2615 = vmatpush.bf16.msra.mxu3 %v4162_v48  ;;  %v4231_v48 = vld [vmem:[%s4650_s30 + $0x4f0] sm:$0xff] }
  0x91   : > { %2577 = vmatpush.bf16.msra.mxu0 %v4137_v51  ;;  %v4222_v51 = vld [vmem:[%s4650_s30 + $0x4a8] sm:$0xff] }
  0x92   : > { %2590 = vmatpush.bf16.msra.mxu1 %v4145_v52  ;;  %v4230_v52 = vld [vmem:[%s4650_s30 + $0x4e8] sm:$0xff] }
  0x93   : > { %2603 = vmatpush.bf16.msra.mxu2 %v4153_v55  ;;  %v4221_v55 = vld [vmem:[%s4650_s30 + $0x4a0] sm:$0xff] }
  0x94   : > { %2616 = vmatpush.bf16.msra.mxu3 %v4161_v56  ;;  %2578 = vmatmul.bf16.vlgmr.msra.gmra.mxu0 %v874_v63  ;;  %v4229_v56 = vld [vmem:[%s4650_s30 + $0x4e0] sm:$0xff]  ;;  %v4219_v63 = vld [vmem:[%s4650_s30 + $0x490] sm:$0xff] }
  0x95   : > { %2622 = vmatpush.bf16.msrb.mxu0 %v4176_v59  ;;  %2591 = vmatmul.bf16.vlgmr.msra.gmra.mxu1 %v875_v1  ;;  %v4220_v59 = vld [vmem:[%s4650_s30 + $0x498] sm:$0xff]  ;;  %v4202_v1 = vld [vmem:[%s4650_s30 + $0x408] sm:$0xff] }
  0x96   : > { %2635 = vmatpush.bf16.msrb.mxu1 %v4184_v60  ;;  %2604 = vmatmul.bf16.vlgmr.msra.gmra.mxu2 %v876_v0  ;;  %v4228_v60 = vld [vmem:[%s4650_s30 + $0x4d8] sm:$0xff]  ;;  %v4227_v0 = vld [vmem:[%s4650_s30 + $0x4d0] sm:$0xff] }
  0x97   : > { %2648 = vmatpush.bf16.msrb.mxu2 %v4192_v61  ;;  %2617 = vmatmul.bf16.vlgmr.msra.gmra.mxu3 %v877_v2  ;;  %v4203_v61 = vld [vmem:[%s4650_s30 + $0x410] sm:$0xff]  ;;  %v4210_v2 = vld [vmem:[%s4650_s30 + $0x448] sm:$0xff] }
  0x98   : > { %2661 = vmatpush.bf16.msrb.mxu3 %v4200_v62  ;;  %v4211_v62 = vld [vmem:[%s4650_s30 + $0x450] sm:$0xff] }
  0x99   : > { %2623 = vmatpush.bf16.msrb.mxu0 %v4175_v3  ;;  %v4218_v3 = vld [vmem:[%s4650_s30 + $0x488] sm:$0xff] }
  0x9a   : > { %2636 = vmatpush.bf16.msrb.mxu1 %v4183_v4  ;;  %v4226_v4 = vld [vmem:[%s4650_s30 + $0x4c8] sm:$0xff] }
  0x9b   : > { %2649 = vmatpush.bf16.msrb.mxu2 %v4191_v5  ;;  %v298_v5 = vld [vmem:[%s4664_s8 + $0x40] sm:$0xff] }
  0x9c   : > { %2662 = vmatpush.bf16.msrb.mxu3 %v4199_v6  ;;  %v299_v6 = vld [vmem:[%s4664_s8 + $0x48] sm:$0xff] }
  0x9d   : > { %2624 = vmatpush.bf16.msrb.mxu0 %v4174_v7  ;;  %v4201_v7 = vld [vmem:[%s4650_s30 + $0x400] sm:$0xff] }
  0x9e   : > { %2637 = vmatpush.bf16.msrb.mxu1 %v4182_v8  ;;  %v4209_v8 = vld [vmem:[%s4650_s30 + $0x440] sm:$0xff] }
  0x9f   : > { %2650 = vmatpush.bf16.msrb.mxu2 %v4190_v9  ;;  %v850_v9 = vunpack.c.l.b16 %v298_v5 }
  0xa0   : > { %2663 = vmatpush.bf16.msrb.mxu3 %v4198_v10  ;;  %v852_v10 = vunpack.c.l.b16 %v299_v6 }
  0xa1   : > { %2625 = vmatpush.bf16.msrb.mxu0 %v4173_v11  ;;  %v4217_v11 = vld [vmem:[%s4650_s30 + $0x480] sm:$0xff] }
  0xa2   : > { %2638 = vmatpush.bf16.msrb.mxu1 %v4181_v12  ;;  %v4225_v12 = vld [vmem:[%s4650_s30 + $0x4c0] sm:$0xff] }
  0xa3   : > { %2651 = vmatpush.bf16.msrb.mxu2 %v4189_v13  ;;  %v851_v13 = vunpack.c.h.b16 %v298_v5  ;;  %v4280_v5 = vld [vmem:[%s4650_s30 + $0x678] sm:$0xff] }
  0xa4   : > { %2664 = vmatpush.bf16.msrb.mxu3 %v4197_v14  ;;  %v853_v14 = vunpack.c.h.b16 %v299_v6  ;;  %v4288_v6 = vld [vmem:[%s4650_s30 + $0x6b8] sm:$0xff] }
  0xa5   : > { %2626 = vmatpush.bf16.msrb.mxu0 %v4172_v15  ;;  %v4240_v15 = vld [vmem:[%s4650_s30 + $0x538] sm:$0xff] }
  0xa6   : > { %2639 = vmatpush.bf16.msrb.mxu1 %v4180_v16  ;;  %v4248_v16 = vld [vmem:[%s4650_s30 + $0x578] sm:$0xff] }
  0xa7   : > { %2652 = vmatpush.bf16.msrb.mxu2 %v4188_v17  ;;  %v4256_v17 = vld [vmem:[%s4650_s30 + $0x5b8] sm:$0xff] }
  0xa8   : > { %2665 = vmatpush.bf16.msrb.mxu3 %v4196_v18  ;;  %v4264_v18 = vld [vmem:[%s4650_s30 + $0x5f8] sm:$0xff] }
  0xa9   : > { %2627 = vmatpush.bf16.msrb.mxu0 %v4171_v19  ;;  %v882_v19 = vpack.c.b16 %v850_v9, %v850_v9 }
  0xaa   : > { %2640 = vmatpush.bf16.msrb.mxu1 %v4179_v20  ;;  %v884_v20 = vpack.c.b16 %v852_v10, %v852_v10 }
  0xab   : > { %2653 = vmatpush.bf16.msrb.mxu2 %v4187_v21  ;;  %v883_v21 = vpack.c.b16 %v851_v13, %v851_v13  ;;  %v4279_v13 = vld [vmem:[%s4650_s30 + $0x670] sm:$0xff] }
  0xac   : > { %2666 = vmatpush.bf16.msrb.mxu3 %v4195_v22  ;;  %v885_v22 = vpack.c.b16 %v853_v14, %v853_v14  ;;  %v4287_v14 = vld [vmem:[%s4650_s30 + $0x6b0] sm:$0xff] }
  0xad   : > { %2628 = vmatpush.bf16.msrb.mxu0 %v4170_v23  ;;  %v4239_v23 = vld [vmem:[%s4650_s30 + $0x530] sm:$0xff] }
  0xae   : > { %2641 = vmatpush.bf16.msrb.mxu1 %v4178_v24  ;;  %v4247_v24 = vld [vmem:[%s4650_s30 + $0x570] sm:$0xff] }
  0xaf   : > { %2654 = vmatpush.bf16.msrb.mxu2 %v4186_v25  ;;  %v4255_v25 = vld [vmem:[%s4650_s30 + $0x5b0] sm:$0xff] }
  0xb0   : > { %2667 = vmatpush.bf16.msrb.mxu3 %v4194_v26  ;;  %v4263_v26 = vld [vmem:[%s4650_s30 + $0x5f0] sm:$0xff] }
  0xb1   : > { %2629 = vmatpush.bf16.msrb.mxu0 %v4169_v29  ;;  %v4254_v29 = vld [vmem:[%s4650_s30 + $0x5a8] sm:$0xff] }
  0xb2   : > { %2642 = vmatpush.bf16.msrb.mxu1 %v4177_v30  ;;  %v4262_v30 = vld [vmem:[%s4650_s30 + $0x5e8] sm:$0xff] }
  0xb3   : > { %2655 = vmatpush.bf16.msrb.mxu2 %v4185_v33  ;;  %v4245_v33 = vld [vmem:[%s4650_s30 + $0x560] sm:$0xff] }
  0xb4   : > { %2668 = vmatpush.bf16.msrb.mxu3 %v4193_v34  ;;  %2630 = vmatmul.bf16.vlgmr.msrb.gmra.mxu0 %v878_v41  ;;  %v4260_v41 = vld [vmem:[%s4650_s30 + $0x5d8] sm:$0xff] }
  0xb5   : > { %2674 = vmatpush.bf16.msra.mxu0 %v4208_v37  ;;  %2643 = vmatmul.bf16.vlgmr.msrb.gmra.mxu1 %v879_v43 }
  0xb6   : > { %2687 = vmatpush.bf16.msra.mxu1 %v4216_v38  ;;  %2656 = vmatmul.bf16.vlgmr.msrb.gmra.mxu2 %v880_v42  ;;  %v4236_v38 = vld [vmem:[%s4650_s30 + $0x518] sm:$0xff] }
  0xb7   : > { %2700 = vmatpush.bf16.msra.mxu2 %v4224_v39  ;;  %2669 = vmatmul.bf16.vlgmr.msrb.gmra.mxu3 %v881_v44  ;;  %v4244_v39 = vld [vmem:[%s4650_s30 + $0x558] sm:$0xff] }
  0xb8   : > { %2713 = vmatpush.bf16.msra.mxu3 %v4232_v40  ;;  %v4252_v40 = vld [vmem:[%s4650_s30 + $0x598] sm:$0xff] }
  0xb9   : > { %2675 = vmatpush.bf16.msra.mxu0 %v4207_v45 }
  0xba   : > { %2688 = vmatpush.bf16.msra.mxu1 %v4215_v46  ;;  %v4235_v46 = vld [vmem:[%s4650_s30 + $0x510] sm:$0xff] }
  0xbb   : > { %2701 = vmatpush.bf16.msra.mxu2 %v4223_v47  ;;  %v4243_v47 = vld [vmem:[%s4650_s30 + $0x550] sm:$0xff] }
  0xbc   : > { %2714 = vmatpush.bf16.msra.mxu3 %v4231_v48 }
  0xbd   : > { %2676 = vmatpush.bf16.msra.mxu0 %v4206_v49 }
  0xbe   : > { %2689 = vmatpush.bf16.msra.mxu1 %v4214_v50  ;;  %v4251_v50 = vld [vmem:[%s4650_s30 + $0x590] sm:$0xff] }
  0xbf   : > { %2702 = vmatpush.bf16.msra.mxu2 %v4222_v51  ;;  %v4259_v51 = vld [vmem:[%s4650_s30 + $0x5d0] sm:$0xff] }
  0xc0   : > { %2715 = vmatpush.bf16.msra.mxu3 %v4230_v52  ;;  %v4234_v52 = vld [vmem:[%s4650_s30 + $0x508] sm:$0xff] }
  0xc1   : > { %2677 = vmatpush.bf16.msra.mxu0 %v4205_v53  ;;  %v4242_v53 = vld [vmem:[%s4650_s30 + $0x548] sm:$0xff] }
  0xc2   : > { %2690 = vmatpush.bf16.msra.mxu1 %v4213_v54  ;;  %v4250_v54 = vld [vmem:[%s4650_s30 + $0x588] sm:$0xff] }
  0xc3   : > { %2703 = vmatpush.bf16.msra.mxu2 %v4221_v55  ;;  %v4258_v55 = vld [vmem:[%s4650_s30 + $0x5c8] sm:$0xff] }
  0xc4   : > { %2716 = vmatpush.bf16.msra.mxu3 %v4229_v56  ;;  %v300_v56 = vld [vmem:[%s4664_s8 + $0x50] sm:$0xff] }
  0xc5   : > { %2678 = vmatpush.bf16.msra.mxu0 %v4204_v57  ;;  %v301_v57 = vld [vmem:[%s4664_s8 + $0x58] sm:$0xff] }
  0xc6   : > { %2691 = vmatpush.bf16.msra.mxu1 %v4212_v58 }
  0xc7   : > { %2704 = vmatpush.bf16.msra.mxu2 %v4220_v59 }
  0xc8   : > { %2717 = vmatpush.bf16.msra.mxu3 %v4228_v60  ;;  %v4233_v60 = vld [vmem:[%s4650_s30 + $0x500] sm:$0xff] }
  0xc9   : > { %2679 = vmatpush.bf16.msra.mxu0 %v4203_v61  ;;  %v4241_v61 = vld [vmem:[%s4650_s30 + $0x540] sm:$0xff] }
  0xca   : > { %2692 = vmatpush.bf16.msra.mxu1 %v4211_v62  ;;  %v854_v62 = vunpack.c.l.b16 %v300_v56 }
  0xcb   : > { %2705 = vmatpush.bf16.msra.mxu2 %v4219_v63  ;;  %v856_v63 = vunpack.c.l.b16 %v301_v57 }
  0xcc   : > { %2718 = vmatpush.bf16.msra.mxu3 %v4227_v0  ;;  %v4249_v0 = vld [vmem:[%s4650_s30 + $0x580] sm:$0xff] }
  0xcd   : > { %2680 = vmatpush.bf16.msra.mxu0 %v4202_v1  ;;  %v4257_v1 = vld [vmem:[%s4650_s30 + $0x5c0] sm:$0xff]  ;;  %v888_v9 = vpack.c.b16 %v856_v63, %v856_v63 }
  0xce   : > { %2693 = vmatpush.bf16.msra.mxu1 %v4210_v2  ;;  %v855_v2 = vunpack.c.h.b16 %v300_v56 }
  0xcf   : > { %2706 = vmatpush.bf16.msra.mxu2 %v4218_v3  ;;  %v857_v3 = vunpack.c.h.b16 %v301_v57 }
  0xd0   : > { %2719 = vmatpush.bf16.msra.mxu3 %v4226_v4  ;;  %v4272_v4 = vld [vmem:[%s4650_s30 + $0x638] sm:$0xff]  ;;  %v887_v10 = vpack.c.b16 %v855_v2, %v855_v2  ;;  %v4303_v2 = vld [vmem:[%s4650_s30 + $0x730] sm:$0xff] }
  0xd1   : > { %2681 = vmatpush.bf16.msra.mxu0 %v4201_v7  ;;  %v2475_v31 = vpop.f32.mrf.mxu0  ;;  %v4296_v7 = vld [vmem:[%s4650_s30 + $0x6f8] sm:$0xff] }
  0xd2   : > { %2694 = vmatpush.bf16.msra.mxu1 %v4209_v8  ;;  %v2488_v34 = vpop.f32.mrf.mxu1  ;;  %v886_v8 = vpack.c.b16 %v854_v62, %v854_v62 }
  0xd3   : > { %2707 = vmatpush.bf16.msra.mxu2 %v4217_v11  ;;  %v2489_v37 = vadd.f32 %v2488_v34, %v2475_v31  ;;  %v889_v11 = vpack.c.b16 %v857_v3, %v857_v3  ;;  %v4292_v31 = vld [vmem:[%s4650_s30 + $0x6d8] sm:$0xff]  ;;  %v4311_v3 = vld [vmem:[%s4650_s30 + $0x770] sm:$0xff] }
  0xd4   : > { %2720 = vmatpush.bf16.msra.mxu3 %v4225_v12  ;;  %2682 = vmatmul.bf16.vlgmr.msra.gmra.mxu0 %v882_v19  ;;  %v4271_v12 = vld [vmem:[%s4650_s30 + $0x630] sm:$0xff]  ;;  %v4294_v19 = vld [vmem:[%s4650_s30 + $0x6e8] sm:$0xff] }
  0xd5   : > { %2726 = vmatpush.bf16.msrb.mxu0 %v4240_v15  ;;  %2695 = vmatmul.bf16.vlgmr.msra.gmra.mxu1 %v883_v21  ;;  %v4295_v15 = vld [vmem:[%s4650_s30 + $0x6f0] sm:$0xff]  ;;  %v4269_v21 = vld [vmem:[%s4650_s30 + $0x620] sm:$0xff] }
  0xd6   : > { %2739 = vmatpush.bf16.msrb.mxu1 %v4248_v16  ;;  %2708 = vmatmul.bf16.vlgmr.msra.gmra.mxu2 %v884_v20  ;;  %v4270_v16 = vld [vmem:[%s4650_s30 + $0x628] sm:$0xff] }
  0xd7   : > { %2752 = vmatpush.bf16.msrb.mxu2 %v4256_v17  ;;  %2721 = vmatmul.bf16.vlgmr.msra.gmra.mxu3 %v885_v22  ;;  %v4278_v17 = vld [vmem:[%s4650_s30 + $0x668] sm:$0xff]  ;;  %v4277_v22 = vld [vmem:[%s4650_s30 + $0x660] sm:$0xff] }
  0xd8   : > { %2765 = vmatpush.bf16.msrb.mxu3 %v4264_v18  ;;  %v4286_v18 = vld [vmem:[%s4650_s30 + $0x6a8] sm:$0xff] }
  0xd9   : > { %2727 = vmatpush.bf16.msrb.mxu0 %v4239_v23  ;;  %v2501_v42 = vpop.f32.mrf.mxu2  ;;  %v2477_v45 = vpop.f32.mrf.mxu0 }
  0xda   : > { %2740 = vmatpush.bf16.msrb.mxu1 %v4247_v24  ;;  %v2502_v43 = vadd.f32 %v2501_v42, %v2489_v37  ;;  %v2514_v44 = vpop.f32.mrf.mxu3  ;;  %v2490_v49 = vpop.f32.mrf.mxu1  ;;  %v4275_v37 = vld [vmem:[%s4650_s30 + $0x650] sm:$0xff]  ;;  %v4266_v42 = vld [vmem:[%s4650_s30 + $0x608] sm:$0xff] }
  0xdb   : > { %2753 = vmatpush.bf16.msrb.mxu2 %v4255_v25  ;;  %v4285_v25 = vld [vmem:[%s4650_s30 + $0x6a0] sm:$0xff]  ;;  %v4290_v45 = vld [vmem:[%s4650_s30 + $0x6c8] sm:$0xff] }
  0xdc   : > { %2766 = vmatpush.bf16.msrb.mxu3 %v4263_v26  ;;  %v4860_v48 = vadd.f32 %v2514_v44, %v2502_v43  ;;  %v4293_v26 = vld [vmem:[%s4650_s30 + $0x6e0] sm:$0xff]  ;;  %v4274_v43 = vld [vmem:[%s4650_s30 + $0x648] sm:$0xff] }
  0xdd   : > { %2728 = vmatpush.bf16.msrb.mxu0 %v4238_v27  ;;  %v4282_v44 = vld [vmem:[%s4650_s30 + $0x688] sm:$0xff] }
  0xde   : > { %2741 = vmatpush.bf16.msrb.mxu1 %v4246_v28  ;;  %v4268_v28 = vld [vmem:[%s4650_s30 + $0x618] sm:$0xff] }
  0xdf   : > { %2754 = vmatpush.bf16.msrb.mxu2 %v4254_v29  ;;  %v4276_v29 = vld [vmem:[%s4650_s30 + $0x658] sm:$0xff] }
  0xe0   : > { %2767 = vmatpush.bf16.msrb.mxu3 %v4262_v30  ;;  %v4284_v30 = vld [vmem:[%s4650_s30 + $0x698] sm:$0xff] }
  0xe1   : > { %2729 = vmatpush.bf16.msrb.mxu0 %v4237_v32  ;;  %v2503_v58 = vpop.f32.mrf.mxu2 }
  0xe2   : > { %2742 = vmatpush.bf16.msrb.mxu1 %v4245_v33  ;;  %v2516_v59 = vpop.f32.mrf.mxu3  ;;  %v4304_v58 = vld [vmem:[%s4650_s30 + $0x738] sm:$0xff] }
  0xe3   : > { %2755 = vmatpush.bf16.msrb.mxu2 %v4253_v35  ;;  %v4312_v59 = vld [vmem:[%s4650_s30 + $0x778] sm:$0xff] }
  0xe4   : > { %2768 = vmatpush.bf16.msrb.mxu3 %v4261_v36  ;;  %v4267_v36 = vld [vmem:[%s4650_s30 + $0x610] sm:$0xff] }
  0xe5   : > { %2730 = vmatpush.bf16.msrb.mxu0 %v4236_v38 }
  0xe6   : > { %2743 = vmatpush.bf16.msrb.mxu1 %v4244_v39 }
  0xe7   : > { %2756 = vmatpush.bf16.msrb.mxu2 %v4252_v40  ;;  %v4283_v40 = vld [vmem:[%s4650_s30 + $0x690] sm:$0xff] }
  0xe8   : > { %2769 = vmatpush.bf16.msrb.mxu3 %v4260_v41  ;;  %v4291_v41 = vld [vmem:[%s4650_s30 + $0x6d0] sm:$0xff] }
  0xe9   : > { %2731 = vmatpush.bf16.msrb.mxu0 %v4235_v46  ;;  %v302_v46 = vld [vmem:[%s4664_s8 + $0x60] sm:$0xff] }
  0xea   : > { %2744 = vmatpush.bf16.msrb.mxu1 %v4243_v47  ;;  %v303_v47 = vld [vmem:[%s4664_s8 + $0x68] sm:$0xff]  ;;  %v859_v56 = vunpack.c.h.b16 %v302_v46 }
  0xeb   : > { %2757 = vmatpush.bf16.msrb.mxu2 %v4251_v50  ;;  %v4265_v50 = vld [vmem:[%s4650_s30 + $0x600] sm:$0xff]  ;;  %v861_v57 = vunpack.c.h.b16 %v303_v47 }
  0xec   : > { %2770 = vmatpush.bf16.msrb.mxu3 %v4259_v51  ;;  %v4273_v51 = vld [vmem:[%s4650_s30 + $0x640] sm:$0xff] }
  0xed   : > { %2732 = vmatpush.bf16.msrb.mxu0 %v4234_v52  ;;  %v858_v52 = vunpack.c.l.b16 %v302_v46  ;;  %v4313_v46 = vld [vmem:[%s4650_s30 + $0x780] sm:$0xff] }
  0xee   : > { %2745 = vmatpush.bf16.msrb.mxu1 %v4242_v53  ;;  %v860_v53 = vunpack.c.l.b16 %v303_v47  ;;  %v4321_v47 = vld [vmem:[%s4650_s30 + $0x7c0] sm:$0xff] }
  0xef   : > { %2758 = vmatpush.bf16.msrb.mxu2 %v4250_v54  ;;  %v4281_v54 = vld [vmem:[%s4650_s30 + $0x680] sm:$0xff]  ;;  %v890_v62 = vpack.c.b16 %v858_v52, %v858_v52 }
  0xf0   : > { %2771 = vmatpush.bf16.msrb.mxu3 %v4258_v55  ;;  %v4289_v55 = vld [vmem:[%s4650_s30 + $0x6c0] sm:$0xff]  ;;  %v892_v63 = vpack.c.b16 %v860_v53, %v860_v53 }
  0xf1   : > { %2733 = vmatpush.bf16.msrb.mxu0 %v4233_v60  ;;  %v2527_v20 = vpop.f32.mrf.mxu0  ;;  %v4320_v60 = vld [vmem:[%s4650_s30 + $0x7b8] sm:$0xff] }
  0xf2   : > { %2746 = vmatpush.bf16.msrb.mxu1 %v4241_v61  ;;  %v2528_v23 = vadd.f32 %v2527_v20, %v4860_v48  ;;  %v2540_v24 = vpop.f32.mrf.mxu1  ;;  %v4328_v61 = vld [vmem:[%s4650_s30 + $0x7f8] sm:$0xff] }
  0xf3   : > { %2759 = vmatpush.bf16.msrb.mxu2 %v4249_v0  ;;  %v891_v0 = vpack.c.b16 %v859_v56, %v859_v56  ;;  %v4316_v20 = vld [vmem:[%s4650_s30 + $0x798] sm:$0xff] }
  0xf4   : > { %2772 = vmatpush.bf16.msrb.mxu3 %v4257_v1  ;;  %2734 = vmatmul.bf16.vlgmr.msrb.gmra.mxu0 %v886_v8  ;;  %v2541_v27 = vadd.f32 %v2540_v24, %v2528_v23  ;;  %v893_v1 = vpack.c.b16 %v861_v57, %v861_v57  ;;  %v4318_v8 = vld [vmem:[%s4650_s30 + $0x7a8] sm:$0xff] }
  0xf5   : > { %2778 = vmatpush.bf16.msra.mxu0 %v4272_v4  ;;  %2747 = vmatmul.bf16.vlgmr.msrb.gmra.mxu1 %v887_v10  ;;  %v4319_v4 = vld [vmem:[%s4650_s30 + $0x7b0] sm:$0xff] }
  0xf6   : > { %2791 = vmatpush.bf16.msra.mxu1 %v4280_v5  ;;  %2760 = vmatmul.bf16.vlgmr.msrb.gmra.mxu2 %v888_v9  ;;  %v4327_v5 = vld [vmem:[%s4650_s30 + $0x7f0] sm:$0xff]  ;;  %v4326_v9 = vld [vmem:[%s4650_s30 + $0x7e8] sm:$0xff] }
  0xf7   : > { %2804 = vmatpush.bf16.msra.mxu2 %v4288_v6  ;;  %2773 = vmatmul.bf16.vlgmr.msrb.gmra.mxu3 %v889_v11  ;;  %v4302_v6 = vld [vmem:[%s4650_s30 + $0x728] sm:$0xff] }
  0xf8   : > { %2817 = vmatpush.bf16.msra.mxu3 %v4296_v7  ;;  %v4310_v7 = vld [vmem:[%s4650_s30 + $0x768] sm:$0xff] }
  0xf9   : > { %2779 = vmatpush.bf16.msra.mxu0 %v4271_v12  ;;  %v2553_v32 = vpop.f32.mrf.mxu2  ;;  %v2529_v35 = vpop.f32.mrf.mxu0  ;;  %v4301_v12 = vld [vmem:[%s4650_s30 + $0x720] sm:$0xff] }
  0xfa   : > { %2792 = vmatpush.bf16.msra.mxu1 %v4279_v13  ;;  %v2554_v33 = vadd.f32 %v2553_v32, %v2541_v27  ;;  %v2566_v34 = vpop.f32.mrf.mxu3  ;;  %v2542_v39 = vpop.f32.mrf.mxu1  ;;  %v4309_v13 = vld [vmem:[%s4650_s30 + $0x760] sm:$0xff]  ;;  %v4299_v27 = vld [vmem:[%s4650_s30 + $0x710] sm:$0xff]  ;;  %v4298_v32 = vld [vmem:[%s4650_s30 + $0x708] sm:$0xff] }
  0xfb   : > { %2805 = vmatpush.bf16.msra.mxu2 %v4287_v14  ;;  %v4314_v35 = vld [vmem:[%s4650_s30 + $0x788] sm:$0xff] }
  0xfc   : > { %2818 = vmatpush.bf16.msra.mxu3 %v4295_v15  ;;  %v4897_v38 = vadd.f32 %v2566_v34, %v2554_v33  ;;  %v4317_v15 = vld [vmem:[%s4650_s30 + $0x7a0] sm:$0xff]  ;;  %v4306_v33 = vld [vmem:[%s4650_s30 + $0x748] sm:$0xff] }
  0xfd   : > { %2780 = vmatpush.bf16.msra.mxu0 %v4270_v16  ;;  %v4325_v16 = vld [vmem:[%s4650_s30 + $0x7e0] sm:$0xff]  ;;  %v304_v34 = vld [vmem:[%s4664_s8 + $0x70] sm:$0xff] }
  0xfe   : > { %2793 = vmatpush.bf16.msra.mxu1 %v4278_v17 }
  0xff   : > { %2806 = vmatpush.bf16.msra.mxu2 %v4286_v18  ;;  %v4300_v18 = vld [vmem:[%s4650_s30 + $0x718] sm:$0xff] }
 0x100   : > { %2819 = vmatpush.bf16.msra.mxu3 %v4294_v19  ;;  %v4308_v19 = vld [vmem:[%s4650_s30 + $0x758] sm:$0xff] }
 0x101   : > { %2781 = vmatpush.bf16.msra.mxu0 %v4269_v21  ;;  %v2555_v48 = vpop.f32.mrf.mxu2  ;;  %v4324_v21 = vld [vmem:[%s4650_s30 + $0x7d8] sm:$0xff] }
 0x102   : > { %2794 = vmatpush.bf16.msra.mxu1 %v4277_v22  ;;  %v2568_v49 = vpop.f32.mrf.mxu3 }
 0x103   : > { %2807 = vmatpush.bf16.msra.mxu2 %v4285_v25 }
 0x104   : > { %2820 = vmatpush.bf16.msra.mxu3 %v4293_v26 }
 0x105   : > { %2782 = vmatpush.bf16.msra.mxu0 %v4268_v28  ;;  %v4307_v28 = vld [vmem:[%s4650_s30 + $0x750] sm:$0xff] }
 0x106   : > { %2795 = vmatpush.bf16.msra.mxu1 %v4276_v29 }
 0x107   : > { %2808 = vmatpush.bf16.msra.mxu2 %v4284_v30  ;;  %v4315_v30 = vld [vmem:[%s4650_s30 + $0x790] sm:$0xff] }
 0x108   : > { %2821 = vmatpush.bf16.msra.mxu3 %v4292_v31  ;;  %v4323_v31 = vld [vmem:[%s4650_s30 + $0x7d0] sm:$0xff] }
 0x109   : > { %2783 = vmatpush.bf16.msra.mxu0 %v4267_v36  ;;  %v4322_v36 = vld [vmem:[%s4650_s30 + $0x7c8] sm:$0xff] }
 0x10a   : > { %2796 = vmatpush.bf16.msra.mxu1 %v4275_v37  ;;  %v305_v37 = vld [vmem:[%s4664_s8 + $0x78] sm:$0xff] }
 0x10b   : > { %2809 = vmatpush.bf16.msra.mxu2 %v4283_v40  ;;  %v862_v40 = vunpack.c.l.b16 %v304_v34 }
 0x10c   : > { %2822 = vmatpush.bf16.msra.mxu3 %v4291_v41  ;;  %v863_v41 = vunpack.c.h.b16 %v304_v34 }
 0x10d   : > { %2784 = vmatpush.bf16.msra.mxu0 %v4266_v42  ;;  %v4297_v42 = vld [vmem:[%s4650_s30 + $0x700] sm:$0xff]  ;;  %v894_v48 = vpack.c.b16 %v862_v40, %v862_v40 }
 0x10e   : > { %2797 = vmatpush.bf16.msra.mxu1 %v4274_v43  ;;  %v4305_v43 = vld [vmem:[%s4650_s30 + $0x740] sm:$0xff]  ;;  %v895_v49 = vpack.c.b16 %v863_v41, %v863_v41 }
 0x10f   : > { %2810 = vmatpush.bf16.msra.mxu2 %v4282_v44  ;;  %v864_v44 = vunpack.c.l.b16 %v305_v37 }
 0x110   : > { %2823 = vmatpush.bf16.msra.mxu3 %v4290_v45  ;;  %v865_v45 = vunpack.c.h.b16 %v305_v37 }
 0x111   : > { %2785 = vmatpush.bf16.msra.mxu0 %v4265_v50  ;;  %v2579_v10 = vpop.f32.mrf.mxu0  ;;  %v896_v50 = vpack.c.b16 %v864_v44, %v864_v44 }
 0x112   : > { %2798 = vmatpush.bf16.msra.mxu1 %v4273_v51  ;;  %v2580_v11 = vadd.f32 %v2579_v10, %v4897_v38  ;;  %v2592_v14 = vpop.f32.mrf.mxu1  ;;  %v897_v51 = vpack.c.b16 %v865_v45, %v865_v45  ;;  %v289_v45 = vld [vmem:[#allocation2] sm:$0xff] }
 0x113   : > { %2811 = vmatpush.bf16.msra.mxu2 %v4281_v54 }
 0x114   : > { %2824 = vmatpush.bf16.msra.mxu3 %v4289_v55  ;;  %2786 = vmatmul.bf16.vlgmr.msra.gmra.mxu0 %v890_v62  ;;  %v2593_v17 = vadd.f32 %v2592_v14, %v2580_v11 }
 0x115   : > { %2830 = vmatpush.bf16.msrb.mxu0 %v4304_v58  ;;  %2799 = vmatmul.bf16.vlgmr.msra.gmra.mxu1 %v891_v0 }
 0x116   : > { %2843 = vmatpush.bf16.msrb.mxu1 %v4312_v59  ;;  %2812 = vmatmul.bf16.vlgmr.msra.gmra.mxu2 %v892_v63 }
 0x117   : > { %2856 = vmatpush.bf16.msrb.mxu2 %v4320_v60  ;;  %2825 = vmatmul.bf16.vlgmr.msra.gmra.mxu3 %v893_v1 }
 0x118   : > { %2869 = vmatpush.bf16.msrb.mxu3 %v4328_v61 }
 0x119   : > { %2831 = vmatpush.bf16.msrb.mxu0 %v4303_v2  ;;  %v2605_v22 = vpop.f32.mrf.mxu2  ;;  %v2581_v25 = vpop.f32.mrf.mxu0 }
 0x11a   : > { %2844 = vmatpush.bf16.msrb.mxu1 %v4311_v3  ;;  %v2606_v23 = vadd.f32 %v2605_v22, %v2593_v17  ;;  %v2618_v24 = vpop.f32.mrf.mxu3  ;;  %v2594_v29 = vpop.f32.mrf.mxu1 }
 0x11b   : > { %2857 = vmatpush.bf16.msrb.mxu2 %v4319_v4 }
 0x11c   : > { %2870 = vmatpush.bf16.msrb.mxu3 %v4327_v5  ;;  %v2619_v26 = vadd.f32 %v2618_v24, %v2606_v23 }
 0x11d   : > { %2832 = vmatpush.bf16.msrb.mxu0 %v4302_v6 }
 0x11e   : > { %2845 = vmatpush.bf16.msrb.mxu1 %v4310_v7 }
 0x11f   : > { %2858 = vmatpush.bf16.msrb.mxu2 %v4318_v8 }
 0x120   : > { %2871 = vmatpush.bf16.msrb.mxu3 %v4326_v9 }
 0x121   : > { %2833 = vmatpush.bf16.msrb.mxu0 %v4301_v12  ;;  %v2607_v38 = vpop.f32.mrf.mxu2 }
 0x122   : > { %2846 = vmatpush.bf16.msrb.mxu1 %v4309_v13  ;;  %v2620_v39 = vpop.f32.mrf.mxu3 }
 0x123   : > { %2859 = vmatpush.bf16.msrb.mxu2 %v4317_v15 }
 0x124   : > { %2872 = vmatpush.bf16.msrb.mxu3 %v4325_v16 }
 0x125   : > { %2834 = vmatpush.bf16.msrb.mxu0 %v4300_v18 }
 0x126   : > { %2847 = vmatpush.bf16.msrb.mxu1 %v4308_v19 }
 0x127   : > { %2860 = vmatpush.bf16.msrb.mxu2 %v4316_v20 }
 0x128   : > { %2873 = vmatpush.bf16.msrb.mxu3 %v4324_v21 }
 0x129   : > { %2835 = vmatpush.bf16.msrb.mxu0 %v4299_v27 }
 0x12a   : > { %2848 = vmatpush.bf16.msrb.mxu1 %v4307_v28 }
 0x12b   : > { %2861 = vmatpush.bf16.msrb.mxu2 %v4315_v30 }
 0x12c   : > { %2874 = vmatpush.bf16.msrb.mxu3 %v4323_v31 }
 0x12d   : > { %2836 = vmatpush.bf16.msrb.mxu0 %v4298_v32 }
 0x12e   : > { %2849 = vmatpush.bf16.msrb.mxu1 %v4306_v33 }
 0x12f   : > { %2862 = vmatpush.bf16.msrb.mxu2 %v4314_v35 }
 0x130   : > { %2875 = vmatpush.bf16.msrb.mxu3 %v4322_v36 }
 0x131   : > { %2837 = vmatpush.bf16.msrb.mxu0 %v4297_v42  ;;  %v2631_v52 = vpop.f32.mrf.mxu0 }
 0x132   : > { %2850 = vmatpush.bf16.msrb.mxu1 %v4305_v43  ;;  %v2632_v53 = vadd.f32 %v2631_v52, %v2619_v26  ;;  %v2644_v54 = vpop.f32.mrf.mxu1 }
 0x133   : > { %2863 = vmatpush.bf16.msrb.mxu2 %v4313_v46 }
 0x134   : > { %2876 = vmatpush.bf16.msrb.mxu3 %v4321_v47  ;;  %2838 = vmatmul.bf16.vlgmr.msrb.gmra.mxu0 %v894_v48  ;;  %v2645_v55 = vadd.f32 %v2644_v54, %v2632_v53 }
 0x135   : > { %2851 = vmatmul.bf16.vlgmr.msrb.gmra.mxu1 %v895_v49 }
 0x136   : > { %2864 = vmatmul.bf16.vlgmr.msrb.gmra.mxu2 %v896_v50 }
 0x137   : > { %2877 = vmatmul.bf16.vlgmr.msrb.gmra.mxu3 %v897_v51 }
 0x139   : > { %v2657_v56 = vpop.f32.mrf.mxu2  ;;  %v2633_v59 = vpop.f32.mrf.mxu0 }
 0x13a   : > { %v2658_v57 = vadd.f32 %v2657_v56, %v2645_v55  ;;  %v2670_v58 = vpop.f32.mrf.mxu3  ;;  %v2646_v61 = vpop.f32.mrf.mxu1 }
 0x13c   : > { %v2671_v60 = vadd.f32 %v2670_v58, %v2658_v57 }
 0x141   : > { %v2659_v62 = vpop.f32.mrf.mxu2 }
 0x142   : > { %v2672_v63 = vpop.f32.mrf.mxu3 }
 0x151   : > { %v2683_v0 = vpop.f32.mrf.mxu0 }
 0x152   : > { %v2684_v1 = vadd.f32 %v2683_v0, %v2671_v60  ;;  %v2696_v2 = vpop.f32.mrf.mxu1 }
 0x154   : > { %v2697_v3 = vadd.f32 %v2696_v2, %v2684_v1 }
 0x159   : > { %v2709_v4 = vpop.f32.mrf.mxu2  ;;  %v2685_v7 = vpop.f32.mrf.mxu0 }
 0x15a   : > { %v2710_v5 = vadd.f32 %v2709_v4, %v2697_v3  ;;  %v2722_v6 = vpop.f32.mrf.mxu3  ;;  %v2698_v9 = vpop.f32.mrf.mxu1 }
 0x15c   : > { %v2723_v8 = vadd.f32 %v2722_v6, %v2710_v5 }
 0x161   : > { %v2711_v10 = vpop.f32.mrf.mxu2 }
 0x162   : > { %v2724_v11 = vpop.f32.mrf.mxu3 }
 0x171   : > { %v2735_v12 = vpop.f32.mrf.mxu0 }
 0x172   : > { %v2748_v13 = vpop.f32.mrf.mxu1  ;;  %v2736_v23 = vadd.f32 %v2735_v12, %v2723_v8 }
 0x174   : > { %v2749_v27 = vadd.f32 %v2748_v13, %v2736_v23 }
 0x179   : > { %v2761_v14 = vpop.f32.mrf.mxu2  ;;  %v2737_v16 = vpop.f32.mrf.mxu0 }
 0x17a   : > { %v2774_v15 = vpop.f32.mrf.mxu3  ;;  %v2750_v17 = vpop.f32.mrf.mxu1  ;;  %v2762_v28 = vadd.f32 %v2761_v14, %v2749_v27 }
 0x17c   : > { %v2775_v31 = vadd.f32 %v2774_v15, %v2762_v28 }
 0x181   : > { %v2763_v18 = vpop.f32.mrf.mxu2 }
 0x182   : > { %v2776_v19 = vpop.f32.mrf.mxu3 }
 0x191   : > { %v2787_v20 = vpop.f32.mrf.mxu0 }
 0x192   : > { %v2800_v21 = vpop.f32.mrf.mxu1  ;;  %v2788_v32 = vadd.f32 %v2787_v20, %v2775_v31 }
 0x194   : > { %v2801_v33 = vadd.f32 %v2800_v21, %v2788_v32 }
 0x199   : > { %v2813_v22 = vpop.f32.mrf.mxu2  ;;  %v2789_v25 = vpop.f32.mrf.mxu0 }
 0x19a   : > { %v2826_v24 = vpop.f32.mrf.mxu3  ;;  %v2802_v26 = vpop.f32.mrf.mxu1  ;;  %v2814_v34 = vadd.f32 %v2813_v22, %v2801_v33 }
 0x19c   : > { %v2827_v35 = vadd.f32 %v2826_v24, %v2814_v34 }
 0x1a1   : > { %v2815_v29 = vpop.f32.mrf.mxu2 }
 0x1a2   : > { %v2828_v30 = vpop.f32.mrf.mxu3 }
 0x1b1   : > { %v2839_v36 = vpop.f32.mrf.mxu0 }
 0x1b2   : > { %v2852_v37 = vpop.f32.mrf.mxu1  ;;  %v2840_v38 = vadd.f32 %v2839_v36, %v2827_v35 }
 0x1b4   : > { %v2853_v39 = vadd.f32 %v2852_v37, %v2840_v38 }
 0x1b9   : > { %v2865_v40 = vpop.f32.mrf.mxu2  ;;  %v2841_v43 = vpop.f32.mrf.mxu0 }
 0x1ba   : > { %v2878_v41 = vpop.f32.mrf.mxu3  ;;  %v2866_v42 = vadd.f32 %v2865_v40, %v2853_v39  ;;  %v2854_v44 = vpop.f32.mrf.mxu1 }
 0x1bc   : > { %v2879_v46 = vadd.f32 %v2878_v41, %v2866_v42 }
 0x1be   : > { %v2882_v47 = vadd.f32 %v2879_v46, %v289_v45  ;;  %2887 = sbr.rel (%p4069_p5) target bundleno = 876 (0x36c), region = 60 }
 0x1c0   : > { %2883 = vst [vmem:[#allocation2] sm:$0xff] %v2882_v47 }
 0x1c1   : > { %v2867_v48 = vpop.f32.mrf.mxu2 }
 0x1c2   : > { %v2880_v49 = vpop.f32.mrf.mxu3 }
 0x1c3   : > { %v2909_v50 = vld [vmem:[%s5017_s3 + $0x78] sm:$0xff]  ;;  %v2908_v51 = vld [vmem:[%s5017_s3 + $0x70] sm:$0xff]  ;;  %v2907_v52 = vld [vmem:[%s5017_s3 + $0x68] sm:$0xff]  ;;  %vm2934_vm0 = vcmask 31744  }
 0x1c4   : > { %2914 = vmatpush.msra.mxu0 %v2909_v50  ;;  %v2906_v53 = vld [vmem:[%s5017_s3 + $0x60] sm:$0xff]  ;;  %v2905_v54 = vld [vmem:[%s5017_s3 + $0x58] sm:$0xff]  ;;  %v2904_v55 = vld [vmem:[%s5017_s3 + $0x50] sm:$0xff] }
 0x1c5   : > { %v2903_v56 = vld [vmem:[%s5017_s3 + $0x48] sm:$0xff]  ;;  %v2902_v57 = vld [vmem:[%s5017_s3 + $0x40] sm:$0xff]  ;;  %v2901_v58 = vld [vmem:[%s5017_s3 + $0x38] sm:$0xff] }
 0x1c6   : > { %2915 = vmatpush.msra.mxu0 %v2908_v51  ;;  %v2900_v59 = vld [vmem:[%s5017_s3 + $0x30] sm:$0xff]  ;;  %v2899_v60 = vld [vmem:[%s5017_s3 + $0x28] sm:$0xff]  ;;  %v2898_v61 = vld [vmem:[%s5017_s3 + $0x20] sm:$0xff] }
 0x1c7   : > { %v2897_v62 = vld [vmem:[%s5017_s3 + $0x18] sm:$0xff]  ;;  %v2896_v63 = vld [vmem:[%s5017_s3 + $0x10] sm:$0xff]  ;;  %v4392_v0 = vld [vmem:[#allocation5] ss:$0 sm:$0xff] }
 0x1c8   : > { %2916 = vmatpush.msra.mxu0 %v2907_v52  ;;  %v2888_v1 = vld [vmem:[#allocation2] sm:$0xff]  ;;  %v2895_v2 = vld [vmem:[%s5017_s3 + $0x8] sm:$0xff] }
 0x1c9   : > { %v2894_v3 = vld [vmem:[%s5017_s3] sm:$0xff]  ;;  %v2893_v4 = vadd.f32 %v4392_v0, %v2888_v1  ;;  %v4393_v5 = vld [vmem:[#allocation7] ss:$0 sm:$0xff] }
 0x1ca   : > { %2917 = vmatpush.msra.mxu0 %v2906_v53 }
 0x1cc   : > { %2918 = vmatpush.msra.mxu0 %v2905_v54 }
 0x1ce   : > { %2919 = vmatpush.msra.mxu0 %v2904_v55 }
 0x1d0   : > { %2920 = vmatpush.msra.mxu0 %v2903_v56 }
 0x1d2   : > { %2921 = vmatpush.msra.mxu0 %v2902_v57 }
 0x1d4   : > { %2922 = vmatpush.msra.mxu0 %v2901_v58 }
 0x1d6   : > { %2923 = vmatpush.msra.mxu0 %v2900_v59 }
 0x1d8   : > { %2924 = vmatpush.msra.mxu0 %v2899_v60 }
 0x1da   : > { %2925 = vmatpush.msra.mxu0 %v2898_v61 }
 0x1dc   : > { %2926 = vmatpush.msra.mxu0 %v2897_v62 }
 0x1de   : > { %2927 = vmatpush.msra.mxu0 %v2896_v63 }
 0x1e0   : > { %2928 = vmatpush.msra.mxu0 %v2895_v2 }
 0x1e2   : > { %2929 = vmatpush.msra.mxu0 %v2894_v3 }
 0x1e3   : > { %2930 = vmatmul.f32.vlgmr.msra.gmra.mxu0 %v2893_v4 }
 0x260   : > { %v2931_v6 = vpop.f32.mrf.mxu0 }
 0x261   : > { %v2932_v7 = vadd.f32 %v4393_v5, %v2931_v6 }
 0x263   : > { %v2935_v8 = vsel %vm2934_vm0, %v2932_v7, -inf }
 0x264   : > { %2936 = vmax.xlane.f32.xlu0 %v2935_v8 }
 0x2d7   : > { %v2937_v9 = vpop.xlane.xlu0 %2936 }
 0x2d8   : > { %v2938_v10 = vsub.f32 %v2932_v7, %v2937_v9 }
 0x2da   : > { %v2939_v11 = vmul.f32 1.442695, %v2938_v10 }
 0x2dc   : > { %4394 = vpow2.f32 %v2939_v11 }
 0x2e2   : > { %v4395_v12 = vpop.eup %4394 }
 0x2e3   : > { %v2941_v13 = vsel %vm2934_vm0, %v4395_v12, 0.0 }
 0x2e4   : > { %2942 = vadd.xlane.f32.xlu0 %v2941_v13 }
 0x357   : > { %v2943_v14 = vpop.xlane.xlu0 %2942 }
 0x358   : > { %4396 = vrcp.f32 %v2943_v14  ;;  %v2955_v18 = vand.u32 2147483648, %v2943_v14  ;;  %v2953_v20 = vand.u32 2147483647, %v2943_v14  ;;  %vm2949_vm2 = vweird.f32 %v2943_v14 }
 0x35a   : > { %v2956_v22 = vor.u32 1.1754944e-38, %v2955_v18  ;;  %vm2954_vm4 = vcmp.eq.f32.partialorder %v2953_v20, 8.507059e+37 }
 0x35e   : > { %v4397_v15 = vpop.eup %4396 }
 0x35f   : > { %v2945_v16 = vmul.f32 %v4397_v15, %v2943_v14  ;;  %vm2950_vm1 = vweird.f32 %v4397_v15 }
 0x360   : > { %vm2951_vm3 = vmor %vm2949_vm2, %vm2950_vm1 }
 0x361   : > { %v2946_v17 = vsub.f32 1.0, %v2945_v16 }
 0x363   : > { %v2947_v19 = vmul.f32 %v4397_v15, %v2946_v17 }
 0x365   : > { %v2948_v21 = vadd.f32 %v4397_v15, %v2947_v19 }
 0x367   : > { %v2952_v23 = vsel %vm2951_vm3, %v4397_v15, %v2948_v21 }
 0x368   : > { %v2957_v24 = vsel %vm2954_vm4, %v2956_v22, %v2952_v23 }
 0x369   : > { %v2958_v25 = vmul.f32 %v4395_v12, %v2957_v24 }
 0x36b   : > { %2959 = vst.msk [vmem:[%s5019_s5] sm:$0xff] %vm2934_vm0, %v2958_v25 }
 0x36c PF: > { %p16_p8 = scmp.ge.s32.totalorder %s4585_s23, 7   ;;  %s5024_s18 = smov %s4518_s19 }
 0x36d   : > { %s5025_s19 = smov %s4522_s20  ;;  %s5026_s20 = smov %s4595_s26 }
 0x36e   : > { %s5027_s21 = smov %s4585_s23  ;;  %18 = sbr.rel (!%p16_p8) target bundleno = 4 (0x4), region = 95 }
 0x373   :  { %2971 = vsyncpa [#allocation4], 1 }
 0x374   :  { %2973 = vsyncpa [#allocation4 + $0x1], 1 }
 0x375   :  { %2974 = vsyncpa [#allocation6], 1 }

</bundles_post_ra>
